<compile_context>
chip_gen: v7x
topology: tpu7x:2x2x1
jax: 0.10.0
libtpu: 0.0.40
codegen_flags: <defaults>
</compile_context>

<pallas_src>
import functools

import jax
import jax.numpy as jnp
from jax.experimental import pallas as pl
from jax.experimental.pallas import tpu as pltpu

LATENT = 20          # true latent width
HALF = 64            # padded latent width (mean / logvar halves of the stats head)
STATS_PAD = 2 * HALF # 128-lane-dense [mean | logvar] stats output
IN_FEATS = 784


def _vae_kernel(
    act_dtype,
    x_ref, eps_ref,
    ew1_ref, eb1_ref, ew2_ref, eb2_ref, ewh_ref, ebh_ref,
    dw1_ref, db1_ref, dw2_ref, db2_ref, dw3_ref, db3_ref,
    out_ref, stats_ref,
):
    f32 = jnp.float32
    bf16 = jnp.bfloat16

    def dense(a, w_ref, b_ref):
        # bf16 MXU matmul with f32 accumulation; bias added in f32.
        return jnp.dot(a.astype(bf16), w_ref[...],
                       preferred_element_type=f32) + b_ref[...]

    def relu(v):
        # Single cast out of the f32 accumulate; ReLU (and the inter-layer
        # carry) run in act_dtype (bf16 on v6e/v7x, f32 on v5e).
        return jnp.maximum(v.astype(act_dtype), 0)

    # ---- Encoder ----
    x = x_ref[...]
    h = relu(dense(x, ew1_ref, eb1_ref))                     # 784 -> 400, ReLU
    h = relu(dense(h, ew2_ref, eb2_ref))                     # 400 -> 200, ReLU
    stats = dense(h, ewh_ref, ebh_ref)                       # 200 -> 128 = [mean|0|logvar|0]
    stats_ref[...] = stats                                   # lane-dense, unmasked store

    # ---- Reparameterization: z = mean + exp(0.5*logvar) * eps (f32) ----
    mean = stats[:, :HALF]                                   # mean in lanes [0,20)
    logvar = stats[:, HALF:]                                 # logvar in lanes [0,20) of this half
    z = mean + jnp.exp(0.5 * logvar) * eps_ref[...]          # padded lanes stay exactly 0

    # ---- Decoder ----
    d = relu(dense(z, dw1_ref, db1_ref))                     # 64(=padded 20) -> 200, ReLU
    d = relu(dense(d, dw2_ref, db2_ref))                     # 200 -> 400, ReLU
    logits = dense(d, dw3_ref, db3_ref).astype(act_dtype)    # 400 -> 784
    # sigmoid(x) = 0.5*tanh(0.5*x) + 0.5 -> one EUP op per vreg (vs exp + rcp).
    out_ref[...] = (0.5 * jnp.tanh(0.5 * logits) + 0.5).astype(out_ref.dtype)


def _round_up(n, m):
    return (n + m - 1) // m * m


def _has_bf16_valu():
    # v6e/v7x have a bf16 VPU; v5e ("v5 lite") does not -> keep f32 activations there.
    try:
        kind = jax.devices()[0].device_kind.lower()
    except Exception:
        return True
    return not any(t in kind for t in ("v5 lite", "v5litepod", "v5e"))


def vae_forward(x, params, eps, *, block_b=None, io_dtype=jnp.bfloat16,
                bf16_activations=None):
    """x: (B, 784), eps: (B, 20). Returns (recon[io_dtype], mean f32, logvar f32)."""
    B = x.shape[0]

    if block_b is None:
        if B > 8:
            # Large tile to amortize per-step overhead, but guarantee >=2 grid
            # steps so ("parallel",) can shard the batch across v7x's two TCs.
            block_b = min(512, _round_up(pl.cdiv(B, 2), 8))
        else:
            block_b = _round_up(max(B, 1), 8)
    block_b = max(8, _round_up(block_b, 8))

    Bp = _round_up(B, block_b)

    if bf16_activations is None:
        bf16_activations = _has_bf16_valu()
    act_dtype = jnp.bfloat16 if bf16_activations else jnp.float32

    # bf16 input (it is consumed in bf16 by the first matmul anyway) -> half the
    # activation DMA bytes.  Pad batch to a multiple of the batch tile.
    x = x.astype(io_dtype)
    if Bp != B:
        x = jnp.pad(x, ((0, Bp - B), (0, 0)))
    # eps padded to the 64-lane latent half; padded lanes are 0 so z's padded
    # lanes are exactly 0 (and dw1's padded rows are 0 anyway).
    eps64 = jnp.zeros((Bp, HALF), jnp.float32).at[:B, :LATENT].set(eps)

    weights = (
        params["ew1"], params["eb1"], params["ew2"], params["eb2"],
        params["ewh"], params["ebh"],
        params["dw1"], params["db1"], params["dw2"], params["db2"],
        params["dw3"], params["db3"],
    )

    def batch_spec(feat):
        return pl.BlockSpec((block_b, feat), lambda i: (i, 0))

    def resident_spec(arr):
        # Full-array block whose index never changes -> stays in VMEM across steps.
        return pl.BlockSpec(arr.shape, lambda i: (0, 0))

    in_specs = ([batch_spec(IN_FEATS), batch_spec(HALF)]
                + [resident_spec(w) for w in weights])
    out_specs = (batch_spec(IN_FEATS), batch_spec(STATS_PAD))
    out_shapes = (
        jax.ShapeDtypeStruct((Bp, IN_FEATS), io_dtype),        # reconstruction
        jax.ShapeDtypeStruct((Bp, STATS_PAD), jnp.float32),    # [mean | logvar], padded
    )

    kernel = functools.partial(_vae_kernel, act_dtype)

    out, stats = pl.pallas_call(
        kernel,
        out_shape=out_shapes,
        grid=(Bp // block_b,),
        in_specs=in_specs,
        out_specs=out_specs,
        compiler_params=pltpu.CompilerParams(
            dimension_semantics=("parallel",),
            vmem_limit_bytes=32 << 20,
        ),
    )(x, eps64, *weights)

    out = out[:B]
    mean = stats[:B, :LATENT]
    logvar = stats[:B, HALF:HALF + LATENT]
    return out, mean, logvar


def init_params(key):
    """Deterministic init mirroring nn.Linear. Weights stored (in, out) in bf16."""
    def linear(k, fan_in, fan_out):
        kw, kb = jax.random.split(k)
        bound = 1.0 / jnp.sqrt(fan_in)
        w = jax.random.uniform(kw, (fan_in, fan_out), jnp.float32, -bound, bound)
        b = jax.random.uniform(kb, (1, fan_out), jnp.float32, -bound, bound)
        return w.astype(jnp.bfloat16), b

    keys = jax.random.split(key, 7)
    p = {}
    p["ew1"], p["eb1"] = linear(keys[0], 784, 400)     # encoder.layer1
    p["ew2"], p["eb2"] = linear(keys[1], 400, 200)     # encoder.layer2
    wm, bm = linear(keys[2], 200, LATENT)              # encoder.layer_mean
    wl, bl = linear(keys[3], 200, LATENT)              # encoder.layer_logvar
    # Fused, 128-lane-padded stats head: mean in lanes [0,20), logvar in [64,84).
    ewh = jnp.zeros((200, STATS_PAD), jnp.bfloat16)
    p["ewh"] = ewh.at[:, :LATENT].set(wm).at[:, HALF:HALF + LATENT].set(wl)
    ebh = jnp.zeros((1, STATS_PAD), jnp.float32)
    p["ebh"] = ebh.at[:, :LATENT].set(bm).at[:, HALF:HALF + LATENT].set(bl)
    dw1, p["db1"] = linear(keys[4], LATENT, 200)       # decoder.layer1
    # z arrives padded to 64 lanes; rows [20, 64) are zero.
    p["dw1"] = jnp.zeros((HALF, 200), jnp.bfloat16).at[:LATENT].set(dw1)
    p["dw2"], p["db2"] = linear(keys[5], 200, 400)     # decoder.layer2
    p["dw3"], p["db3"] = linear(keys[6], 400, 784)     # decoder.layer3
    return p


def reference_forward(x, params, eps):
    """Pure-JAX reference mirroring the kernel's bf16-matmul / f32-accumulate math."""
    f32 = jnp.float32

    def dense(a, w, b):
        return jnp.dot(a.astype(jnp.bfloat16), w, preferred_element_type=f32) + b

    relu = lambda v: jnp.maximum(v, 0.0)
    h = relu(dense(x, params["ew1"], params["eb1"]))
    h = relu(dense(h, params["ew2"], params["eb2"]))
    mean = dense(h, params["ewh"][:, :LATENT], params["ebh"][:, :LATENT])
    logvar = dense(h, params["ewh"][:, HALF:HALF + LATENT],
                   params["ebh"][:, HALF:HALF + LATENT])
    z = mean + jnp.exp(0.5 * logvar) * eps
    d = relu(dense(z, params["dw1"][:LATENT], params["db1"]))
    d = relu(dense(d, params["dw2"], params["db2"]))
    out = jax.nn.sigmoid(dense(d, params["dw3"], params["db3"]))
    return out, mean, logvar


if __name__ == "__main__":
    key = jax.random.PRNGKey(0)
    k_params, k_x, k_eps = jax.random.split(key, 3)

    B = 16
    params = init_params(k_params)
    x = jax.random.normal(k_x, (B, 784), jnp.float32)
    # torch.randn_like(logvar) counterpart: fixed, deterministic noise passed in.
    eps = jax.random.normal(k_eps, (B, LATENT), jnp.float32)

    run = jax.jit(vae_forward)           # auto block_b -> 8, grid=(2,): exercises tiling
    out, mean, logvar = run(x, params, eps)
    jax.block_until_ready((out, mean, logvar))

    ref_out, ref_mean, ref_logvar = reference_forward(x, params, eps)
    assert out.shape == (B, 784) and mean.shape == (B, LATENT) and logvar.shape == (B, LATENT)
    # bf16 matmuls/activations + tanh-form sigmoid -> relaxed (but tight) tolerances.
    assert jnp.allclose(out.astype(jnp.float32), ref_out, atol=1e-2, rtol=1e-2)
    assert jnp.allclose(mean, ref_mean, atol=1e-2, rtol=1e-2)
    assert jnp.allclose(logvar, ref_logvar, atol=1e-2, rtol=1e-2)

    print("KERNEL_OK")
</pallas_src>

<mosaic_0001>
module attributes {stable_mosaic.version = 11 : i64} {
  func.func @_vae_kernel(%arg0: i32, %arg1: memref<8x784xbf16, #tpu.memory_space<vmem>>, %arg2: memref<8x64xf32, #tpu.memory_space<vmem>>, %arg3: memref<784x400xbf16, #tpu.memory_space<vmem>>, %arg4: memref<1x400xf32, #tpu.memory_space<vmem>>, %arg5: memref<400x200xbf16, #tpu.memory_space<vmem>>, %arg6: memref<1x200xf32, #tpu.memory_space<vmem>>, %arg7: memref<200x128xbf16, #tpu.memory_space<vmem>>, %arg8: memref<1x128xf32, #tpu.memory_space<vmem>>, %arg9: memref<64x200xbf16, #tpu.memory_space<vmem>>, %arg10: memref<1x200xf32, #tpu.memory_space<vmem>>, %arg11: memref<200x400xbf16, #tpu.memory_space<vmem>>, %arg12: memref<1x400xf32, #tpu.memory_space<vmem>>, %arg13: memref<400x784xbf16, #tpu.memory_space<vmem>>, %arg14: memref<1x784xf32, #tpu.memory_space<vmem>>, %arg15: memref<8x784xbf16, #tpu.memory_space<vmem>>, %arg16: memref<8x128xf32, #tpu.memory_space<vmem>>) attributes {dimension_semantics = [#tpu.dimension_semantics<parallel>], iteration_bounds = array<i64: 2>, scalar_prefetch = 0 : i64, scratch_operands = 0 : i64, tpu.core_type = #tpu.core_type<tc>, window_params = [{transform_indices = @transform_0, window_bounds = array<i64: 8, 784>}, {transform_indices = @transform_1, window_bounds = array<i64: 8, 64>}, {pipeline_mode = #tpu.pipeline_mode<synchronous>, transform_indices = @transform_2, window_bounds = array<i64: 784, 400>}, {pipeline_mode = #tpu.pipeline_mode<synchronous>, transform_indices = @transform_3, window_bounds = array<i64: 1, 400>}, {pipeline_mode = #tpu.pipeline_mode<synchronous>, transform_indices = @transform_4, window_bounds = array<i64: 400, 200>}, {pipeline_mode = #tpu.pipeline_mode<synchronous>, transform_indices = @transform_5, window_bounds = array<i64: 1, 200>}, {pipeline_mode = #tpu.pipeline_mode<synchronous>, transform_indices = @transform_6, window_bounds = array<i64: 200, 128>}, {pipeline_mode = #tpu.pipeline_mode<synchronous>, transform_indices = @transform_7, window_bounds = array<i64: 1, 128>}, {pipeline_mode = #tpu.pipeline_mode<synchronous>, transform_indices = @transform_8, window_bounds = array<i64: 64, 200>}, {pipeline_mode = #tpu.pipeline_mode<synchronous>, transform_indices = @transform_9, window_bounds = array<i64: 1, 200>}, {pipeline_mode = #tpu.pipeline_mode<synchronous>, transform_indices = @transform_10, window_bounds = array<i64: 200, 400>}, {pipeline_mode = #tpu.pipeline_mode<synchronous>, transform_indices = @transform_11, window_bounds = array<i64: 1, 400>}, {pipeline_mode = #tpu.pipeline_mode<synchronous>, transform_indices = @transform_12, window_bounds = array<i64: 400, 784>}, {pipeline_mode = #tpu.pipeline_mode<synchronous>, transform_indices = @transform_13, window_bounds = array<i64: 1, 784>}, {transform_indices = @transform_14, window_bounds = array<i64: 8, 784>}, {transform_indices = @transform_15, window_bounds = array<i64: 8, 128>}]} {
    %c0 = arith.constant 0 : index
    %c0_0 = arith.constant 0 : index
    %0 = vector.load %arg1[%c0, %c0_0] : memref<8x784xbf16, #tpu.memory_space<vmem>>, vector<8x784xbf16>
    %c0_1 = arith.constant 0 : index
    %c0_2 = arith.constant 0 : index
    %1 = vector.load %arg3[%c0_1, %c0_2] : memref<784x400xbf16, #tpu.memory_space<vmem>>, vector<784x400xbf16>
    %cst = arith.constant dense<0.000000e+00> : vector<8x400xf32>
    %2 = tpu.matmul %0, %1, %cst {dimension_numbers = #tpu.dot_dimension_numbers<[1], [0], [0], [1], [0, 0, 1, 1], [], []>} : vector<8x784xbf16>, vector<784x400xbf16>, vector<8x400xf32> -> vector<8x400xf32>
    %c0_3 = arith.constant 0 : index
    %c0_4 = arith.constant 0 : index
    %3 = vector.load %arg4[%c0_3, %c0_4] : memref<1x400xf32, #tpu.memory_space<vmem>>, vector<1x400xf32>
    %4 = vector.broadcast %3 : vector<1x400xf32> to vector<8x400xf32>
    %5 = arith.addf %2, %4 : vector<8x400xf32>
    %6 = arith.truncf %5 : vector<8x400xf32> to vector<8x400xbf16>
    %cst_5 = arith.constant 0.000000e+00 : bf16
    %7 = vector.broadcast %cst_5 : bf16 to vector<8x400xbf16>
    %8 = arith.maximumf %6, %7 : vector<8x400xbf16>
    %c0_6 = arith.constant 0 : index
    %c0_7 = arith.constant 0 : index
    %9 = vector.load %arg5[%c0_6, %c0_7] : memref<400x200xbf16, #tpu.memory_space<vmem>>, vector<400x200xbf16>
    %cst_8 = arith.constant dense<0.000000e+00> : vector<8x200xf32>
    %10 = tpu.matmul %8, %9, %cst_8 {dimension_numbers = #tpu.dot_dimension_numbers<[1], [0], [0], [1], [0, 0, 1, 1], [], []>} : vector<8x400xbf16>, vector<400x200xbf16>, vector<8x200xf32> -> vector<8x200xf32>
    %c0_9 = arith.constant 0 : index
    %c0_10 = arith.constant 0 : index
    %11 = vector.load %arg6[%c0_9, %c0_10] : memref<1x200xf32, #tpu.memory_space<vmem>>, vector<1x200xf32>
    %12 = vector.broadcast %11 : vector<1x200xf32> to vector<8x200xf32>
    %13 = arith.addf %10, %12 : vector<8x200xf32>
    %14 = arith.truncf %13 : vector<8x200xf32> to vector<8x200xbf16>
    %cst_11 = arith.constant 0.000000e+00 : bf16
    %15 = vector.broadcast %cst_11 : bf16 to vector<8x200xbf16>
    %16 = arith.maximumf %14, %15 : vector<8x200xbf16>
    %c0_12 = arith.constant 0 : index
    %c0_13 = arith.constant 0 : index
    %17 = vector.load %arg7[%c0_12, %c0_13] : memref<200x128xbf16, #tpu.memory_space<vmem>>, vector<200x128xbf16>
    %cst_14 = arith.constant dense<0.000000e+00> : vector<8x128xf32>
    %18 = tpu.matmul %16, %17, %cst_14 {dimension_numbers = #tpu.dot_dimension_numbers<[1], [0], [0], [1], [0, 0, 1, 1], [], []>} : vector<8x200xbf16>, vector<200x128xbf16>, vector<8x128xf32> -> vector<8x128xf32>
    %c0_15 = arith.constant 0 : index
    %c0_16 = arith.constant 0 : index
    %19 = vector.load %arg8[%c0_15, %c0_16] : memref<1x128xf32, #tpu.memory_space<vmem>>, vector<1x128xf32>
    %20 = vector.broadcast %19 : vector<1x128xf32> to vector<8x128xf32>
    %21 = arith.addf %18, %20 : vector<8x128xf32>
    %c0_17 = arith.constant 0 : index
    %c0_18 = arith.constant 0 : index
    %22 = vector.load %arg16[%c0_17, %c0_18] : memref<8x128xf32, #tpu.memory_space<vmem>>, vector<8x128xf32>
    tpu.vector_store %arg16[%c0_17, %c0_18], %21 {strides = array<i32>} : memref<8x128xf32, #tpu.memory_space<vmem>>, vector<8x128xf32>,
    %23 = vector.extract_strided_slice %21 {offsets = [0, 0], sizes = [8, 64], strides = [1, 1]} : vector<8x128xf32> to vector<8x64xf32>
    %24 = vector.extract_strided_slice %21 {offsets = [0, 64], sizes = [8, 64], strides = [1, 1]} : vector<8x128xf32> to vector<8x64xf32>
    %cst_19 = arith.constant 5.000000e-01 : f32
    %25 = vector.broadcast %cst_19 : f32 to vector<8x64xf32>
    %26 = arith.mulf %25, %24 : vector<8x64xf32>
    %27 = math.exp %26 : vector<8x64xf32>
    %c0_20 = arith.constant 0 : index
    %c0_21 = arith.constant 0 : index
    %28 = vector.load %arg2[%c0_20, %c0_21] : memref<8x64xf32, #tpu.memory_space<vmem>>, vector<8x64xf32>
    %29 = arith.mulf %27, %28 : vector<8x64xf32>
    %30 = arith.addf %23, %29 : vector<8x64xf32>
    %31 = arith.truncf %30 : vector<8x64xf32> to vector<8x64xbf16>
    %c0_22 = arith.constant 0 : index
    %c0_23 = arith.constant 0 : index
    %32 = vector.load %arg9[%c0_22, %c0_23] : memref<64x200xbf16, #tpu.memory_space<vmem>>, vector<64x200xbf16>
    %cst_24 = arith.constant dense<0.000000e+00> : vector<8x200xf32>
    %33 = tpu.matmul %31, %32, %cst_24 {dimension_numbers = #tpu.dot_dimension_numbers<[1], [0], [0], [1], [0, 0, 1, 1], [], []>} : vector<8x64xbf16>, vector<64x200xbf16>, vector<8x200xf32> -> vector<8x200xf32>
    %c0_25 = arith.constant 0 : index
    %c0_26 = arith.constant 0 : index
    %34 = vector.load %arg10[%c0_25, %c0_26] : memref<1x200xf32, #tpu.memory_space<vmem>>, vector<1x200xf32>
    %35 = vector.broadcast %34 : vector<1x200xf32> to vector<8x200xf32>
    %36 = arith.addf %33, %35 : vector<8x200xf32>
    %37 = arith.truncf %36 : vector<8x200xf32> to vector<8x200xbf16>
    %cst_27 = arith.constant 0.000000e+00 : bf16
    %38 = vector.broadcast %cst_27 : bf16 to vector<8x200xbf16>
    %39 = arith.maximumf %37, %38 : vector<8x200xbf16>
    %c0_28 = arith.constant 0 : index
    %c0_29 = arith.constant 0 : index
    %40 = vector.load %arg11[%c0_28, %c0_29] : memref<200x400xbf16, #tpu.memory_space<vmem>>, vector<200x400xbf16>
    %cst_30 = arith.constant dense<0.000000e+00> : vector<8x400xf32>
    %41 = tpu.matmul %39, %40, %cst_30 {dimension_numbers = #tpu.dot_dimension_numbers<[1], [0], [0], [1], [0, 0, 1, 1], [], []>} : vector<8x200xbf16>, vector<200x400xbf16>, vector<8x400xf32> -> vector<8x400xf32>
    %c0_31 = arith.constant 0 : index
    %c0_32 = arith.constant 0 : index
    %42 = vector.load %arg12[%c0_31, %c0_32] : memref<1x400xf32, #tpu.memory_space<vmem>>, vector<1x400xf32>
    %43 = vector.broadcast %42 : vector<1x400xf32> to vector<8x400xf32>
    %44 = arith.addf %41, %43 : vector<8x400xf32>
    %45 = arith.truncf %44 : vector<8x400xf32> to vector<8x400xbf16>
    %cst_33 = arith.constant 0.000000e+00 : bf16
    %46 = vector.broadcast %cst_33 : bf16 to vector<8x400xbf16>
    %47 = arith.maximumf %45, %46 : vector<8x400xbf16>
    %c0_34 = arith.constant 0 : index
    %c0_35 = arith.constant 0 : index
    %48 = vector.load %arg13[%c0_34, %c0_35] : memref<400x784xbf16, #tpu.memory_space<vmem>>, vector<400x784xbf16>
    %cst_36 = arith.constant dense<0.000000e+00> : vector<8x784xf32>
    %49 = tpu.matmul %47, %48, %cst_36 {dimension_numbers = #tpu.dot_dimension_numbers<[1], [0], [0], [1], [0, 0, 1, 1], [], []>} : vector<8x400xbf16>, vector<400x784xbf16>, vector<8x784xf32> -> vector<8x784xf32>
    %c0_37 = arith.constant 0 : index
    %c0_38 = arith.constant 0 : index
    %50 = vector.load %arg14[%c0_37, %c0_38] : memref<1x784xf32, #tpu.memory_space<vmem>>, vector<1x784xf32>
    %51 = vector.broadcast %50 : vector<1x784xf32> to vector<8x784xf32>
    %52 = arith.addf %49, %51 : vector<8x784xf32>
    %53 = arith.truncf %52 : vector<8x784xf32> to vector<8x784xbf16>
    %cst_39 = arith.constant 5.000000e-01 : bf16
    %54 = vector.broadcast %cst_39 : bf16 to vector<8x784xbf16>
    %55 = arith.mulf %54, %53 : vector<8x784xbf16>
    %56 = math.tanh %55 : vector<8x784xbf16>
    %cst_40 = arith.constant 5.000000e-01 : bf16
    %57 = vector.broadcast %cst_40 : bf16 to vector<8x784xbf16>
    %58 = arith.mulf %57, %56 : vector<8x784xbf16>
    %cst_41 = arith.constant 5.000000e-01 : bf16
    %59 = vector.broadcast %cst_41 : bf16 to vector<8x784xbf16>
    %60 = arith.addf %58, %59 : vector<8x784xbf16>
    %c0_42 = arith.constant 0 : index
    %c0_43 = arith.constant 0 : index
    %61 = vector.load %arg15[%c0_42, %c0_43] : memref<8x784xbf16, #tpu.memory_space<vmem>>, vector<8x784xbf16>
    tpu.vector_store %arg15[%c0_42, %c0_43], %60 {strides = array<i32>} : memref<8x784xbf16, #tpu.memory_space<vmem>>, vector<8x784xbf16>,
    return
  }
  func.func @transform_0(%arg0: i32) -> (i32, i32) {
    %c0_i32 = arith.constant 0 : i32
    %c0_i32_0 = arith.constant 0 : i32
    return %arg0, %c0_i32 : i32, i32
  }
  func.func @transform_1(%arg0: i32) -> (i32, i32) {
    %c0_i32 = arith.constant 0 : i32
    %c0_i32_0 = arith.constant 0 : i32
    return %arg0, %c0_i32 : i32, i32
  }
  func.func @transform_2(%arg0: i32) -> (i32, i32) {
    %c0_i32 = arith.constant 0 : i32
    %c0_i32_0 = arith.constant 0 : i32
    %c0_i32_1 = arith.constant 0 : i32
    return %c0_i32, %c0_i32_0 : i32, i32
  }
  func.func @transform_3(%arg0: i32) -> (i32, i32) {
    %c0_i32 = arith.constant 0 : i32
    %c0_i32_0 = arith.constant 0 : i32
    %c0_i32_1 = arith.constant 0 : i32
    return %c0_i32, %c0_i32_0 : i32, i32
  }
  func.func @transform_4(%arg0: i32) -> (i32, i32) {
    %c0_i32 = arith.constant 0 : i32
    %c0_i32_0 = arith.constant 0 : i32
    %c0_i32_1 = arith.constant 0 : i32
    return %c0_i32, %c0_i32_0 : i32, i32
  }
  func.func @transform_5(%arg0: i32) -> (i32, i32) {
    %c0_i32 = arith.constant 0 : i32
    %c0_i32_0 = arith.constant 0 : i32
    %c0_i32_1 = arith.constant 0 : i32
    return %c0_i32, %c0_i32_0 : i32, i32
  }
  func.func @transform_6(%arg0: i32) -> (i32, i32) {
    %c0_i32 = arith.constant 0 : i32
    %c0_i32_0 = arith.constant 0 : i32
    %c0_i32_1 = arith.constant 0 : i32
    return %c0_i32, %c0_i32_0 : i32, i32
  }
  func.func @transform_7(%arg0: i32) -> (i32, i32) {
    %c0_i32 = arith.constant 0 : i32
    %c0_i32_0 = arith.constant 0 : i32
    %c0_i32_1 = arith.constant 0 : i32
    return %c0_i32, %c0_i32_0 : i32, i32
  }
  func.func @transform_8(%arg0: i32) -> (i32, i32) {
    %c0_i32 = arith.constant 0 : i32
    %c0_i32_0 = arith.constant 0 : i32
    %c0_i32_1 = arith.constant 0 : i32
    return %c0_i32, %c0_i32_0 : i32, i32
  }
  func.func @transform_9(%arg0: i32) -> (i32, i32) {
    %c0_i32 = arith.constant 0 : i32
    %c0_i32_0 = arith.constant 0 : i32
    %c0_i32_1 = arith.constant 0 : i32
    return %c0_i32, %c0_i32_0 : i32, i32
  }
  func.func @transform_10(%arg0: i32) -> (i32, i32) {
    %c0_i32 = arith.constant 0 : i32
    %c0_i32_0 = arith.constant 0 : i32
    %c0_i32_1 = arith.constant 0 : i32
    return %c0_i32, %c0_i32_0 : i32, i32
  }
  func.func @transform_11(%arg0: i32) -> (i32, i32) {
    %c0_i32 = arith.constant 0 : i32
    %c0_i32_0 = arith.constant 0 : i32
    %c0_i32_1 = arith.constant 0 : i32
    return %c0_i32, %c0_i32_0 : i32, i32
  }
  func.func @transform_12(%arg0: i32) -> (i32, i32) {
    %c0_i32 = arith.constant 0 : i32
    %c0_i32_0 = arith.constant 0 : i32
    %c0_i32_1 = arith.constant 0 : i32
    return %c0_i32, %c0_i32_0 : i32, i32
  }
  func.func @transform_13(%arg0: i32) -> (i32, i32) {
    %c0_i32 = arith.constant 0 : i32
    %c0_i32_0 = arith.constant 0 : i32
    %c0_i32_1 = arith.constant 0 : i32
    return %c0_i32, %c0_i32_0 : i32, i32
  }
  func.func @transform_14(%arg0: i32) -> (i32, i32) {
    %c0_i32 = arith.constant 0 : i32
    %c0_i32_0 = arith.constant 0 : i32
    return %arg0, %c0_i32 : i32, i32
  }
  func.func @transform_15(%arg0: i32) -> (i32, i32) {
    %c0_i32 = arith.constant 0 : i32
    %c0_i32_0 = arith.constant 0 : i32
    return %arg0, %c0_i32 : i32, i32
  }
}

</mosaic_0001>

<bundles_post_ra>
// kernel: vae_forward.1
= control target key start
LH: loop header
LB: loop body
LE: loop exit
PB: predicated region body
PF: predicated region fallthrough
CT: control target
= control target key end

     0   :  { %s8150_s0 = inlined_call_operand.vmem [shape: bf16[16,784], index: 0, kind: input, shape index: {}]   ;;  %s8151_s1 = inlined_call_operand.vmem [shape: f32[16,64], index: 1, kind: input, shape index: {}]   ;;  %s8152_s2 = inlined_call_operand.vmem [shape: bf16[784,400], index: 2, kind: input, shape index: {}]   ;;  %s8153_s3 = inlined_call_operand.vmem [shape: f32[1,400], index: 3, kind: input, shape index: {}]   ;;  %s8154_s4 = inlined_call_operand.vmem [shape: bf16[400,200], index: 4, kind: input, shape index: {}]   ;;  %s8155_s5 = inlined_call_operand.vmem [shape: f32[1,200], index: 5, kind: input, shape index: {}]   ;;  %s8156_s6 = inlined_call_operand.vmem [shape: bf16[200,128], index: 6, kind: input, shape index: {}]   ;;  %s8157_s7 = inlined_call_operand.vmem [shape: f32[1,128], index: 7, kind: input, shape index: {}]   ;;  %s8158_s8 = inlined_call_operand.vmem [shape: bf16[64,200], index: 8, kind: input, shape index: {}]   ;;  %s8159_s9 = inlined_call_operand.vmem [shape: f32[1,200], index: 9, kind: input, shape index: {}]   ;;  %s8160_s10 = inlined_call_operand.vmem [shape: bf16[200,400], index: 10, kind: input, shape index: {}]   ;;  %s8161_s11 = inlined_call_operand.vmem [shape: f32[1,400], index: 11, kind: input, shape index: {}]   ;;  %s8162_s12 = inlined_call_operand.vmem [shape: bf16[400,784], index: 12, kind: input, shape index: {}]   ;;  %s8163_s13 = inlined_call_operand.vmem [shape: f32[1,784], index: 13, kind: input, shape index: {}]   ;;  %s8164_s14 = inlined_call_operand.hbm [shape: bf16[16,784], index: 14, kind: output, shape index: {0}]   ;;  %s8165_s15 = inlined_call_operand.vmem [shape: f32[16,128], index: 15, kind: output, shape index: {1}]  }
   0x1   :  { %8173 = sst [smem:[#allocation11_spill]] %s8150_s0 }
   0x2   :  { %8174 = sst [smem:[#allocation12_spill]] %s8164_s14 }
   0x3   :  { %21 = vsyncpa [#allocation3], 0 }
   0x4   :  { %23 = vsyncpa [#allocation3 + $0x1], 0  ;;  %s6379_s18 = smov 0   ;;  %s6381_s19 = smov 0  }
   0x5   :  { %s6383_s20 = smov 0   ;;  %s6385_s21 = smov 0  }
   0x6 LB: > { %8175 = sst [smem:[#allocation5_spill]] %s6282_s18  ;;  %s6400_s22 = sadd.s32 4294967295, %s6294_s21   ;;  %s6294_s21 = sphi %s6385_s21, %s8188_s21   ;;  %s6290_s20 = sphi %s6383_s20, %s8190_s20   ;;  %s6286_s19 = sphi %s6381_s19, %s8192_s19   ;;  %s6282_s18 = sphi %s6379_s18, %s8191_s18  }
   0x7   : > { %8176 = sst [smem:[#allocation6_spill]] %s6290_s20  ;;  %s4842_s23 = sadd.s32 4294967294, %s6294_s21  }
   0x8   : > { %8177 = sst [smem:[#allocation7_spill]] %s6294_s21  ;;  %s6404_s24 = sadd.s32 1, %s6294_s21  }
   0x9   : > { %8178 = sst [smem:[#allocation8_spill]] %s6404_s24  ;;  %s340_s25 = sadd.s32 1, %s6290_s20 }
   0xa   : > { %s337_s26 = ssub.s32 %s6294_s21, %s6404_s24  ;;  %p350_p0 = scmp.ne.s32.totalorder %s6290_s20, %s6286_s19 }
   0xb   : > { %p338_p1 = scmp.eq.s32.totalorder %s337_s26, 0  ;;  %p351_p2 = scmp.eq.s32.totalorder %s6400_s22, 1 }
   0xc   : > { %p356_p3 = scmp.ne.s32.totalorder %s6286_s19, %s6282_s18  ;;  %p357_p4 = scmp.eq.s32.totalorder %s4842_s23, 1 }
   0xd   : > { %s6415_s27 = scalar_select %p338_p1, %s6290_s20, %s340_s25  }
   0xe   : > { %p6417_p5 = por %p351_p2, %p350_p0  ;;  %p6421_p6 = por %p357_p4, %p356_p3 }
   0xf   : > { %8179 = sst [smem:[#allocation9_spill]] %s6415_s27  ;;  %p4845_p7 = scmp.ge.s32.totalorder %s6294_s21, 1 }
  0x10   : > { %s8181_s29 = scalar_select %p6421_p6, 1, 0 }
  0x11   : > { %p452_p8 = scmp.lt.s32.totalorder %s6294_s21, 3 }
  0x12   : > { %8182 = sst [smem:[#allocation10_spill]] %s8181_s29 }
  0x13   : > { %p453_p9 = pnand %p4845_p7, %p452_p8 }
  0x14   : > { %v5489_v0 = vld [vmem:[%s8152_s2 + $0x4] ss:$16 sps:$4 sm:$0xff] (!%p453_p9)   ;;  %v5491_v1 = vld [vmem:[%s8152_s2 + $0xc] ss:$16 sps:$4 sm:$0xff] (!%p453_p9)   ;;  %v5493_v2 = vld [vmem:[%s8152_s2] ss:$16 sps:$4 sm:$0xff] (!%p453_p9)  }
  0x15   : > { %456 = sbr.rel (%p453_p9) target bundleno = 1878 (0x756), region = 76  ;;  %1753 = vmatprep.subr.bf16.mxu0 (!%p453_p9), %v5489_v0  ;;  %v5494_v3 = vld [vmem:[%s8152_s2 + $0x8] ss:$16 sps:$4 sm:$0xff] (!%p453_p9)   ;;  %1917 = vmatprep.subr.bf16.mxu1 (!%p453_p9), %v5491_v1  ;;  %v5495_v4 = vld [vmem:[%s8152_s2 + $0x24] ss:$16 sps:$4 sm:$0xff] (!%p453_p9)   ;;  %p508_p10 = scmp.lt.s32.totalorder (!%p453_p9), %s6400_s22, 1 }
  0x16   : > { %1754 = vmatpush1.bf16.msra.mxu0 (!%p453_p9), %v5493_v2  ;;  %1918 = vmatpush1.bf16.msra.mxu1 (!%p453_p9), %v5494_v3  ;;  %v5497_v5 = vld [vmem:[%s8152_s2 + $0x2c] ss:$16 sps:$4 sm:$0xff] (!%p453_p9)   ;;  %v5499_v6 = vld [vmem:[%s8152_s2 + $0x20] ss:$16 sps:$4 sm:$0xff] (!%p453_p9)   ;;  %v5500_v7 = vld [vmem:[%s8152_s2 + $0x28] ss:$16 sps:$4 sm:$0xff] (!%p453_p9)  }
  0x17   : > { %1755 = vmatprep.subr.bf16.mxu0 (!%p453_p9), %v5495_v4  ;;  %1919 = vmatprep.subr.bf16.mxu1 (!%p453_p9), %v5497_v5  ;;  %v5501_v8 = vld [vmem:[%s8152_s2 + $0x44] ss:$16 sps:$4 sm:$0xff] (!%p453_p9)   ;;  %v5503_v9 = vld [vmem:[%s8152_s2 + $0x4c] ss:$16 sps:$4 sm:$0xff] (!%p453_p9)   ;;  %v5505_v10 = vld [vmem:[%s8152_s2 + $0x40] ss:$16 sps:$4 sm:$0xff] (!%p453_p9)  }
  0x18   : > { %v5506_v11 = vld [vmem:[%s8152_s2 + $0x48] ss:$16 sps:$4 sm:$0xff] (!%p453_p9)   ;;  %v5507_v12 = vld [vmem:[%s8152_s2 + $0x64] ss:$16 sps:$4 sm:$0xff] (!%p453_p9)   ;;  %v5509_v13 = vld [vmem:[%s8152_s2 + $0x6c] ss:$16 sps:$4 sm:$0xff] (!%p453_p9)  }
  0x19   : > { %v5511_v14 = vld [vmem:[%s8152_s2 + $0x60] ss:$16 sps:$4 sm:$0xff] (!%p453_p9)   ;;  %v5512_v15 = vld [vmem:[%s8152_s2 + $0x68] ss:$16 sps:$4 sm:$0xff] (!%p453_p9)   ;;  %v5513_v16 = vld [vmem:[%s8152_s2 + $0x84] ss:$16 sps:$4 sm:$0xff] (!%p453_p9)  }
  0x1a   : > { %1756 = vmatpush1.bf16.msra.mxu0 (!%p453_p9), %v5499_v6  ;;  %1920 = vmatpush1.bf16.msra.mxu1 (!%p453_p9), %v5500_v7  ;;  %v5515_v17 = vld [vmem:[%s8152_s2 + $0x8c] ss:$16 sps:$4 sm:$0xff] (!%p453_p9)   ;;  %v5517_v18 = vld [vmem:[%s8152_s2 + $0x80] ss:$16 sps:$4 sm:$0xff] (!%p453_p9)   ;;  %v5518_v19 = vld [vmem:[%s8152_s2 + $0x88] ss:$16 sps:$4 sm:$0xff] (!%p453_p9)  }
  0x1b   : > { %1757 = vmatprep.subr.bf16.mxu0 (!%p453_p9), %v5501_v8  ;;  %1921 = vmatprep.subr.bf16.mxu1 (!%p453_p9), %v5503_v9  ;;  %v5519_v20 = vld [vmem:[%s8152_s2 + $0xa4] ss:$16 sps:$4 sm:$0xff] (!%p453_p9)   ;;  %v5521_v21 = vld [vmem:[%s8152_s2 + $0xac] ss:$16 sps:$4 sm:$0xff] (!%p453_p9)   ;;  %v5523_v22 = vld [vmem:[%s8152_s2 + $0xa0] ss:$16 sps:$4 sm:$0xff] (!%p453_p9)  }
  0x1c   : > { %v5524_v23 = vld [vmem:[%s8152_s2 + $0xa8] ss:$16 sps:$4 sm:$0xff]   ;;  %v5525_v24 = vld [vmem:[%s8152_s2 + $0xc4] ss:$16 sps:$4 sm:$0xff]   ;;  %v5527_v25 = vld [vmem:[%s8152_s2 + $0xcc] ss:$16 sps:$4 sm:$0xff]  }
  0x1d   : > { %v5529_v26 = vld [vmem:[%s8152_s2 + $0xc0] ss:$16 sps:$4 sm:$0xff]   ;;  %v5530_v27 = vld [vmem:[%s8152_s2 + $0xc8] ss:$16 sps:$4 sm:$0xff]   ;;  %v5531_v28 = vld [vmem:[%s8152_s2 + $0xe4] ss:$16 sps:$4 sm:$0xff]  }
  0x1e   : > { %1758 = vmatpush1.bf16.msra.mxu0 %v5505_v10  ;;  %1922 = vmatpush1.bf16.msra.mxu1 %v5506_v11  ;;  %v5533_v29 = vld [vmem:[%s8152_s2 + $0xec] ss:$16 sps:$4 sm:$0xff]   ;;  %v5535_v30 = vld [vmem:[%s8152_s2 + $0xe0] ss:$16 sps:$4 sm:$0xff]   ;;  %v5536_v31 = vld [vmem:[%s8152_s2 + $0xe8] ss:$16 sps:$4 sm:$0xff]  }
  0x1f   : > { %1759 = vmatprep.subr.bf16.mxu0 %v5507_v12  ;;  %1923 = vmatprep.subr.bf16.mxu1 %v5509_v13  ;;  %v5537_v32 = vld [vmem:[%s8152_s2 + $0x104] ss:$16 sps:$4 sm:$0xff]   ;;  %v5539_v33 = vld [vmem:[%s8152_s2 + $0x10c] ss:$16 sps:$4 sm:$0xff]   ;;  %v5541_v34 = vld [vmem:[%s8152_s2 + $0x100] ss:$16 sps:$4 sm:$0xff]  }
  0x20   : > { %v5542_v35 = vld [vmem:[%s8152_s2 + $0x108] ss:$16 sps:$4 sm:$0xff]   ;;  %s6537_s17 = scalar_select %p508_p10, %s6400_s22, 1  ;;  %v5543_v36 = vld [vmem:[%s8152_s2 + $0x124] ss:$16 sps:$4 sm:$0xff]   ;;  %vm1749_vm0 = vcmask 130048  }
  0x21   : > { %v5545_v37 = vld [vmem:[%s8152_s2 + $0x12c] ss:$16 sps:$4 sm:$0xff]   ;;  %v5547_v38 = vld [vmem:[%s8152_s2 + $0x120] ss:$16 sps:$4 sm:$0xff]   ;;  %v5548_v39 = vld [vmem:[%s8152_s2 + $0x128] ss:$16 sps:$4 sm:$0xff]  }
  0x22   : > { %1760 = vmatpush1.bf16.msra.mxu0 %v5511_v14  ;;  %1924 = vmatpush1.bf16.msra.mxu1 %v5512_v15  ;;  %s5446_s29 = smul.u32 28, %s6537_s17  ;;  %v5549_v40 = vld [vmem:[%s8152_s2 + $0x144] ss:$16 sps:$4 sm:$0xff]   ;;  %v5551_v41 = vld [vmem:[%s8152_s2 + $0x14c] ss:$16 sps:$4 sm:$0xff]   ;;  %s8183_s0 = sld [smem:[#allocation11_spill]] }
  0x23   : > { %1761 = vmatprep.subr.bf16.mxu0 %v5513_v16  ;;  %1925 = vmatprep.subr.bf16.mxu1 %v5515_v17  ;;  %v5553_v42 = vld [vmem:[%s8152_s2 + $0x140] ss:$16 sps:$4 sm:$0xff]   ;;  %v5554_v43 = vld [vmem:[%s8152_s2 + $0x148] ss:$16 sps:$4 sm:$0xff]   ;;  %v5555_v44 = vld [vmem:[%s8152_s2 + $0x164] ss:$16 sps:$4 sm:$0xff]  }
  0x24   : > { %v5557_v45 = vld [vmem:[%s8152_s2 + $0x16c] ss:$16 sps:$4 sm:$0xff]   ;;  %v5559_v47 = vld [vmem:[%s8152_s2 + $0x160] ss:$16 sps:$4 sm:$0xff]   ;;  %v5560_v49 = vld [vmem:[%s8152_s2 + $0x168] ss:$16 sps:$4 sm:$0xff]  }
  0x25   : > { %v5561_v50 = vld [vmem:[%s8152_s2 + $0x184] ss:$16 sps:$4 sm:$0xff]   ;;  %v5563_v51 = vld [vmem:[%s8152_s2 + $0x18c] ss:$16 sps:$4 sm:$0xff]   ;;  %v5565_v52 = vld [vmem:[%s8152_s2 + $0x180] ss:$16 sps:$4 sm:$0xff]  }
  0x26   : > { %1762 = vmatpush1.bf16.msra.mxu0 %v5517_v18  ;;  %1926 = vmatpush1.bf16.msra.mxu1 %v5518_v19  ;;  %v5566_v53 = vld [vmem:[%s8152_s2 + $0x188] ss:$16 sps:$4 sm:$0xff]   ;;  %v5567_v54 = vld [vmem:[%s8152_s2 + $0x1a4] ss:$16 sps:$4 sm:$0xff]   ;;  %v5569_v55 = vld [vmem:[%s8152_s2 + $0x1ac] ss:$16 sps:$4 sm:$0xff]  }
  0x27   : > { %1763 = vmatprep.subr.bf16.mxu0 %v5519_v20  ;;  %1927 = vmatprep.subr.bf16.mxu1 %v5521_v21  ;;  %v5571_v56 = vld [vmem:[%s8152_s2 + $0x1a0] ss:$16 sps:$4 sm:$0xff]   ;;  %v5572_v57 = vld [vmem:[%s8152_s2 + $0x1a8] ss:$16 sps:$4 sm:$0xff]   ;;  %v5573_v58 = vld [vmem:[%s8152_s2 + $0x1c4] ss:$16 sps:$4 sm:$0xff]  }
  0x28   : > { %s6567_s14 = scalar_lea.vmem %s8183_s0, %s5446_s29  ;;  %v5575_v59 = vld [vmem:[%s8152_s2 + $0x1cc] ss:$16 sps:$4 sm:$0xff]   ;;  %v5577_v60 = vld [vmem:[%s8152_s2 + $0x1c0] ss:$16 sps:$4 sm:$0xff]   ;;  %v5578_v61 = vld [vmem:[%s8152_s2 + $0x1c8] ss:$16 sps:$4 sm:$0xff]  }
  0x29   : > { %v523_v46 = vld [vmem:[%s6567_s14] sm:$0xff]  ;;  %v5581_v63 = vld [vmem:[%s8152_s2 + $0x1ec] ss:$16 sps:$4 sm:$0xff]   ;;  %v5584_v1 = vld [vmem:[%s8152_s2 + $0x1e8] ss:$16 sps:$4 sm:$0xff]   ;;  %vm2601_vm1 = vcmask 1043456  }
  0x2a   : > { %1764 = vmatpush1.bf16.msra.mxu0 %v5523_v22  ;;  %1928 = vmatpush1.bf16.msra.mxu1 %v5524_v23  ;;  %v4850_v48 = vcombine.high %v523_v46, %v523_v46  ;;  %v5579_v62 = vld [vmem:[%s8152_s2 + $0x1e4] ss:$16 sps:$4 sm:$0xff]   ;;  %v5583_v0 = vld [vmem:[%s8152_s2 + $0x1e0] ss:$16 sps:$4 sm:$0xff]   ;;  %v5593_v3 = vld [vmem:[%s8152_s2 + $0x20c] ss:$16 sps:$4 sm:$0xff]   ;;  %v4849_v4 = vcombine.low %v523_v46, %v523_v46 }
  0x2b   : > { %1765 = vmatprep.subr.bf16.mxu0 %v5525_v24  ;;  %1929 = vmatprep.subr.bf16.mxu1 %v5527_v25  ;;  %v5590_v2 = vld [vmem:[%s8152_s2 + $0x204] ss:$16 sps:$4 sm:$0xff]   ;;  %v5588_v5 = vld [vmem:[%s8152_s2 + $0x200] ss:$16 sps:$4 sm:$0xff]   ;;  %v5591_v6 = vld [vmem:[%s8152_s2 + $0x208] ss:$16 sps:$4 sm:$0xff]  }
  0x2c   : > { %1785 = vmatprep.mubr.bf16.mxu0 %v4850_v48  ;;  %1949 = vmatprep.mubr.bf16.mxu1 %v4850_v48  ;;  %v5596_v7 = vld [vmem:[%s8152_s2 + $0x224] ss:$16 sps:$4 sm:$0xff]   ;;  %v5599_v8 = vld [vmem:[%s8152_s2 + $0x22c] ss:$16 sps:$4 sm:$0xff]   ;;  %v5594_v9 = vld [vmem:[%s8152_s2 + $0x220] ss:$16 sps:$4 sm:$0xff]  }
  0x2d   : > { %v5597_v10 = vld [vmem:[%s8152_s2 + $0x228] ss:$16 sps:$4 sm:$0xff]   ;;  %v5602_v11 = vld [vmem:[%s8152_s2 + $0x244] ss:$16 sps:$4 sm:$0xff]   ;;  %v5605_v12 = vld [vmem:[%s8152_s2 + $0x24c] ss:$16 sps:$4 sm:$0xff]  }
  0x2e   : > { %1766 = vmatpush1.bf16.msra.mxu0 %v5529_v26  ;;  %1930 = vmatpush1.bf16.msra.mxu1 %v5530_v27  ;;  %v5600_v13 = vld [vmem:[%s8152_s2 + $0x240] ss:$16 sps:$4 sm:$0xff]   ;;  %v5603_v14 = vld [vmem:[%s8152_s2 + $0x248] ss:$16 sps:$4 sm:$0xff]   ;;  %v5608_v15 = vld [vmem:[%s8152_s2 + $0x264] ss:$16 sps:$4 sm:$0xff]  }
  0x2f   : > { %1767 = vmatprep.subr.bf16.mxu0 %v5531_v28  ;;  %1931 = vmatprep.subr.bf16.mxu1 %v5533_v29  ;;  %v5611_v16 = vld [vmem:[%s8152_s2 + $0x26c] ss:$16 sps:$4 sm:$0xff]   ;;  %v5606_v17 = vld [vmem:[%s8152_s2 + $0x260] ss:$16 sps:$4 sm:$0xff]   ;;  %v5609_v18 = vld [vmem:[%s8152_s2 + $0x268] ss:$16 sps:$4 sm:$0xff]  }
  0x30   : > { %v5614_v19 = vld [vmem:[%s8152_s2 + $0x284] ss:$16 sps:$4 sm:$0xff]   ;;  %v5617_v20 = vld [vmem:[%s8152_s2 + $0x28c] ss:$16 sps:$4 sm:$0xff]   ;;  %v5612_v21 = vld [vmem:[%s8152_s2 + $0x280] ss:$16 sps:$4 sm:$0xff]  }
  0x31   : > { %v5615_v22 = vld [vmem:[%s8152_s2 + $0x288] ss:$16 sps:$4 sm:$0xff]   ;;  %v5620_v23 = vld [vmem:[%s8152_s2 + $0x2a4] ss:$16 sps:$4 sm:$0xff]   ;;  %v5623_v24 = vld [vmem:[%s8152_s2 + $0x2ac] ss:$16 sps:$4 sm:$0xff]  }
  0x32   : > { %1768 = vmatpush1.bf16.msra.mxu0 %v5535_v30  ;;  %1932 = vmatpush1.bf16.msra.mxu1 %v5536_v31  ;;  %v5618_v25 = vld [vmem:[%s8152_s2 + $0x2a0] ss:$16 sps:$4 sm:$0xff]   ;;  %v5621_v26 = vld [vmem:[%s8152_s2 + $0x2a8] ss:$16 sps:$4 sm:$0xff]   ;;  %v5626_v27 = vld [vmem:[%s8152_s2 + $0x2c4] ss:$16 sps:$4 sm:$0xff]  }
  0x33   : > { %1769 = vmatprep.subr.bf16.mxu0 %v5537_v32  ;;  %1933 = vmatprep.subr.bf16.mxu1 %v5539_v33  ;;  %v5629_v28 = vld [vmem:[%s8152_s2 + $0x2cc] ss:$16 sps:$4 sm:$0xff]   ;;  %v5624_v30 = vld [vmem:[%s8152_s2 + $0x2c0] ss:$16 sps:$4 sm:$0xff]   ;;  %v5627_v31 = vld [vmem:[%s8152_s2 + $0x2c8] ss:$16 sps:$4 sm:$0xff]  }
  0x34   : > { %v6709_v29 = vld [vmem:[%s6567_s14 + $0x8] sm:$0xff]  ;;  %v5632_v33 = vld [vmem:[%s8152_s2 + $0x2e4] ss:$16 sps:$4 sm:$0xff]   ;;  %s4847_s30 = sshll.u32 %s6537_s17, 3  ;;  %s6297_s25 = smov 64   ;;  %vm2597_vm2 = vcmask 588800  }
  0x35   : > { %v4852_v32 = vcombine.high %v6709_v29, %v6709_v29  ;;  %v5653_v46 = vld [vmem:[%s8152_s2 + $0x34c] ss:$16 sps:$4 sm:$0xff]   ;;  %v5651_v48 = vld [vmem:[%s8152_s2 + $0x348] ss:$16 sps:$4 sm:$0xff]   ;;  %s516_s23 = scalar_lea.vmem %s8151_s1, %s4847_s30  ;;  %vm2721_vm3 = vcmask 523264   ;;  %vm4723_vm4 = vcmask 125952  }
  0x36   : > { %1770 = vmatpush1.bf16.msra.mxu0 %v5541_v34  ;;  %1934 = vmatpush1.bf16.msra.mxu1 %v5542_v35  ;;  %v5635_v34 = vld [vmem:[%s8152_s2 + $0x2ec] ss:$16 sps:$4 sm:$0xff]   ;;  %v5630_v35 = vld [vmem:[%s8152_s2 + $0x2e0] ss:$16 sps:$4 sm:$0xff]   ;;  %s5447_s17 = smul.u32 448, %s6400_s22  ;;  %s8184_s0 = sld [smem:[#allocation12_spill]] }
  0x37   : > { %1771 = vmatprep.subr.bf16.mxu0 %v5543_v36  ;;  %1935 = vmatprep.subr.bf16.mxu1 %v5545_v37  ;;  %v5633_v36 = vld [vmem:[%s8152_s2 + $0x2e8] ss:$16 sps:$4 sm:$0xff]   ;;  %v5638_v37 = vld [vmem:[%s8152_s2 + $0x304] ss:$16 sps:$4 sm:$0xff]   ;;  %s6298_s22 = smov [#allocation2]  }
  0x38   : > { %s6236_s27 = sshll.u32 %s6298_s22, 4  ;;  %s6237_s27 = int_to_ptr.vmem [resolvable:$false] %s6236_s27 }
  0x39   : > { %s6238_s24 = scalar_lea.vmem %s6237_s27, 896 }
  0x3a   : > { %1772 = vmatpush1.bf16.msra.mxu0 %v5547_v38  ;;  %1936 = vmatpush1.bf16.msra.mxu1 %v5548_v39  ;;  %v5641_v38 = vld [vmem:[%s8152_s2 + $0x30c] ss:$16 sps:$4 sm:$0xff]   ;;  %v5636_v39 = vld [vmem:[%s8152_s2 + $0x300] ss:$16 sps:$4 sm:$0xff]  }
  0x3b   : > { %1773 = vmatprep.subr.bf16.mxu0 %v5549_v40  ;;  %1937 = vmatprep.subr.bf16.mxu1 %v5551_v41  ;;  %v5639_v40 = vld [vmem:[%s8152_s2 + $0x308] ss:$16 sps:$4 sm:$0xff]   ;;  %v5644_v41 = vld [vmem:[%s8152_s2 + $0x324] ss:$16 sps:$4 sm:$0xff]  }
  0x3c   : > { %s8105_s21 = scalar_lea.hbm %s8184_s0, %s5447_s17 }
  0x3e   : > { %1774 = vmatpush1.bf16.msra.mxu0 %v5553_v42  ;;  %1938 = vmatpush1.bf16.msra.mxu1 %v5554_v43  ;;  %v5647_v42 = vld [vmem:[%s8152_s2 + $0x32c] ss:$16 sps:$4 sm:$0xff]   ;;  %v5642_v43 = vld [vmem:[%s8152_s2 + $0x320] ss:$16 sps:$4 sm:$0xff]  }
  0x3f   : > { %1775 = vmatprep.subr.bf16.mxu0 %v5555_v44  ;;  %1939 = vmatprep.subr.bf16.mxu1 %v5557_v45  ;;  %v5645_v44 = vld [vmem:[%s8152_s2 + $0x328] ss:$16 sps:$4 sm:$0xff]   ;;  %v5650_v45 = vld [vmem:[%s8152_s2 + $0x344] ss:$16 sps:$4 sm:$0xff]  }
  0x42   : > { %1776 = vmatpush1.bf16.msra.mxu0 %v5559_v47  ;;  %1940 = vmatpush1.bf16.msra.mxu1 %v5560_v49  ;;  %v5648_v47 = vld [vmem:[%s8152_s2 + $0x340] ss:$16 sps:$4 sm:$0xff]   ;;  %v5656_v49 = vld [vmem:[%s8152_s2 + $0x364] ss:$16 sps:$4 sm:$0xff]  }
  0x43   : > { %1777 = vmatprep.subr.bf16.mxu0 %v5561_v50  ;;  %1941 = vmatprep.subr.bf16.mxu1 %v5563_v51  ;;  %v5659_v50 = vld [vmem:[%s8152_s2 + $0x36c] ss:$16 sps:$4 sm:$0xff]   ;;  %v5654_v51 = vld [vmem:[%s8152_s2 + $0x360] ss:$16 sps:$4 sm:$0xff]  }
  0x46   : > { %1778 = vmatpush1.bf16.msra.mxu0 %v5565_v52  ;;  %1942 = vmatpush1.bf16.msra.mxu1 %v5566_v53  ;;  %v5657_v52 = vld [vmem:[%s8152_s2 + $0x368] ss:$16 sps:$4 sm:$0xff]   ;;  %v5662_v53 = vld [vmem:[%s8152_s2 + $0x384] ss:$16 sps:$4 sm:$0xff]  }
  0x47   : > { %1779 = vmatprep.subr.bf16.mxu0 %v5567_v54  ;;  %1943 = vmatprep.subr.bf16.mxu1 %v5569_v55  ;;  %v5665_v54 = vld [vmem:[%s8152_s2 + $0x38c] ss:$16 sps:$4 sm:$0xff]   ;;  %v5660_v55 = vld [vmem:[%s8152_s2 + $0x380] ss:$16 sps:$4 sm:$0xff]  }
  0x4a   : > { %1780 = vmatpush1.bf16.msra.mxu0 %v5571_v56  ;;  %1944 = vmatpush1.bf16.msra.mxu1 %v5572_v57  ;;  %v5663_v56 = vld [vmem:[%s8152_s2 + $0x388] ss:$16 sps:$4 sm:$0xff]   ;;  %v5668_v57 = vld [vmem:[%s8152_s2 + $0x3a4] ss:$16 sps:$4 sm:$0xff]  }
  0x4b   : > { %1781 = vmatprep.subr.bf16.mxu0 %v5573_v58  ;;  %1945 = vmatprep.subr.bf16.mxu1 %v5575_v59  ;;  %v5671_v58 = vld [vmem:[%s8152_s2 + $0x3ac] ss:$16 sps:$4 sm:$0xff]   ;;  %v5666_v59 = vld [vmem:[%s8152_s2 + $0x3a0] ss:$16 sps:$4 sm:$0xff]  }
  0x4e   : > { %1782 = vmatpush1.bf16.msra.mxu0 %v5577_v60  ;;  %1946 = vmatpush1.bf16.msra.mxu1 %v5578_v61  ;;  %v5669_v60 = vld [vmem:[%s8152_s2 + $0x3a8] ss:$16 sps:$4 sm:$0xff]   ;;  %v5674_v61 = vld [vmem:[%s8152_s2 + $0x3c4] ss:$16 sps:$4 sm:$0xff]  }
  0x4f   : > { %1783 = vmatprep.subr.bf16.mxu0 %v5579_v62  ;;  %1947 = vmatprep.subr.bf16.mxu1 %v5581_v63  ;;  %v5677_v62 = vld [vmem:[%s8152_s2 + $0x3cc] ss:$16 sps:$4 sm:$0xff]   ;;  %v5672_v63 = vld [vmem:[%s8152_s2 + $0x3c0] ss:$16 sps:$4 sm:$0xff]  }
  0x52   : > { %1784 = vmatpush1.bf16.msra.mxu0 %v5583_v0  ;;  %1948 = vmatpush1.bf16.msra.mxu1 %v5584_v1  ;;  %v5675_v0 = vld [vmem:[%s8152_s2 + $0x3c8] ss:$16 sps:$4 sm:$0xff]   ;;  %v5680_v1 = vld [vmem:[%s8152_s2 + $0x3e4] ss:$16 sps:$4 sm:$0xff]  }
  0x53   : > { %1794 = vmatprep.subr.bf16.mxu0 %v5590_v2  ;;  %1958 = vmatprep.subr.bf16.mxu1 %v5593_v3  ;;  %v5683_v2 = vld [vmem:[%s8152_s2 + $0x3ec] ss:$16 sps:$4 sm:$0xff]   ;;  %v5678_v3 = vld [vmem:[%s8152_s2 + $0x3e0] ss:$16 sps:$4 sm:$0xff]  }
  0x55   : > { %1786 = vmatmul.mubr.bf16.vlgmr.msra.gmra.mrb[0].mxu0 %v4849_v4  ;;  %1950 = vmatmul.mubr.bf16.vlgmr.msra.gmra.mrb[0].mxu1 %v4849_v4  ;;  %v5681_v4 = vld [vmem:[%s8152_s2 + $0x3e8] ss:$16 sps:$4 sm:$0xff]  }
  0x56   : > { %1795 = vmatpush1.bf16.msra.mxu0 %v5588_v5  ;;  %1959 = vmatpush1.bf16.msra.mxu1 %v5591_v6  ;;  %v5688_v5 = vld [vmem:[%s8152_s2 + $0x404] ss:$16 sps:$4 sm:$0xff]   ;;  %v5691_v6 = vld [vmem:[%s8152_s2 + $0x40c] ss:$16 sps:$4 sm:$0xff]  }
  0x57   : > { %1796 = vmatprep.subr.bf16.mxu0 %v5596_v7  ;;  %1960 = vmatprep.subr.bf16.mxu1 %v5599_v8  ;;  %v4851_v7 = vcombine.low %v6709_v29, %v6709_v29  ;;  %v5686_v8 = vld [vmem:[%s8152_s2 + $0x400] ss:$16 sps:$4 sm:$0xff]   ;;  %v5721_v29 = vld [vmem:[%s8152_s2 + $0x4ac] ss:$16 sps:$4 sm:$0xff]  }
  0x58   : > { %1826 = vmatprep.mubr.bf16.mxu0 %v4852_v32  ;;  %1990 = vmatprep.mubr.bf16.mxu1 %v4852_v32  ;;  %v5724_v32 = vld [vmem:[%s8152_s2 + $0x4c4] ss:$16 sps:$4 sm:$0xff]  }
  0x5a   : > { %1797 = vmatpush1.bf16.msra.mxu0 %v5594_v9  ;;  %1961 = vmatpush1.bf16.msra.mxu1 %v5597_v10  ;;  %v5689_v9 = vld [vmem:[%s8152_s2 + $0x408] ss:$16 sps:$4 sm:$0xff]   ;;  %v5694_v10 = vld [vmem:[%s8152_s2 + $0x424] ss:$16 sps:$4 sm:$0xff]  }
  0x5b   : > { %1798 = vmatprep.subr.bf16.mxu0 %v5602_v11  ;;  %1962 = vmatprep.subr.bf16.mxu1 %v5605_v12  ;;  %v5697_v11 = vld [vmem:[%s8152_s2 + $0x42c] ss:$16 sps:$4 sm:$0xff]   ;;  %v6848_v12 = vld [vmem:[%s6567_s14 + $0x10] sm:$0xff] }
  0x5e   : > { %1799 = vmatpush1.bf16.msra.mxu0 %v5600_v13  ;;  %1963 = vmatpush1.bf16.msra.mxu1 %v5603_v14  ;;  %v4854_v13 = vcombine.high %v6848_v12, %v6848_v12  ;;  %v5692_v14 = vld [vmem:[%s8152_s2 + $0x420] ss:$16 sps:$4 sm:$0xff]  }
  0x5f   : > { %1800 = vmatprep.subr.bf16.mxu0 %v5608_v15  ;;  %1964 = vmatprep.subr.bf16.mxu1 %v5611_v16  ;;  %v5695_v15 = vld [vmem:[%s8152_s2 + $0x428] ss:$16 sps:$4 sm:$0xff]   ;;  %v5700_v16 = vld [vmem:[%s8152_s2 + $0x444] ss:$16 sps:$4 sm:$0xff]  }
  0x62   : > { %1801 = vmatpush1.bf16.msra.mxu0 %v5606_v17  ;;  %1965 = vmatpush1.bf16.msra.mxu1 %v5609_v18  ;;  %v5703_v17 = vld [vmem:[%s8152_s2 + $0x44c] ss:$16 sps:$4 sm:$0xff]   ;;  %v5698_v18 = vld [vmem:[%s8152_s2 + $0x440] ss:$16 sps:$4 sm:$0xff]  }
  0x63   : > { %1802 = vmatprep.subr.bf16.mxu0 %v5614_v19  ;;  %1966 = vmatprep.subr.bf16.mxu1 %v5617_v20  ;;  %v5701_v19 = vld [vmem:[%s8152_s2 + $0x448] ss:$16 sps:$4 sm:$0xff]   ;;  %v5706_v20 = vld [vmem:[%s8152_s2 + $0x464] ss:$16 sps:$4 sm:$0xff]  }
  0x66   : > { %1803 = vmatpush1.bf16.msra.mxu0 %v5612_v21  ;;  %1967 = vmatpush1.bf16.msra.mxu1 %v5615_v22  ;;  %v5709_v21 = vld [vmem:[%s8152_s2 + $0x46c] ss:$16 sps:$4 sm:$0xff]   ;;  %v5704_v22 = vld [vmem:[%s8152_s2 + $0x460] ss:$16 sps:$4 sm:$0xff]  }
  0x67   : > { %1804 = vmatprep.subr.bf16.mxu0 %v5620_v23  ;;  %1968 = vmatprep.subr.bf16.mxu1 %v5623_v24  ;;  %v5707_v23 = vld [vmem:[%s8152_s2 + $0x468] ss:$16 sps:$4 sm:$0xff]   ;;  %v5712_v24 = vld [vmem:[%s8152_s2 + $0x484] ss:$16 sps:$4 sm:$0xff]  }
  0x6a   : > { %1805 = vmatpush1.bf16.msra.mxu0 %v5618_v25  ;;  %1969 = vmatpush1.bf16.msra.mxu1 %v5621_v26  ;;  %v5715_v25 = vld [vmem:[%s8152_s2 + $0x48c] ss:$16 sps:$4 sm:$0xff]   ;;  %v5710_v26 = vld [vmem:[%s8152_s2 + $0x480] ss:$16 sps:$4 sm:$0xff]  }
  0x6b   : > { %1806 = vmatprep.subr.bf16.mxu0 %v5626_v27  ;;  %1970 = vmatprep.subr.bf16.mxu1 %v5629_v28  ;;  %v5713_v27 = vld [vmem:[%s8152_s2 + $0x488] ss:$16 sps:$4 sm:$0xff]   ;;  %v5718_v28 = vld [vmem:[%s8152_s2 + $0x4a4] ss:$16 sps:$4 sm:$0xff]  }
  0x6e   : > { %1807 = vmatpush1.bf16.msra.mxu0 %v5624_v30  ;;  %1971 = vmatpush1.bf16.msra.mxu1 %v5627_v31  ;;  %v5716_v30 = vld [vmem:[%s8152_s2 + $0x4a0] ss:$16 sps:$4 sm:$0xff]   ;;  %v5719_v31 = vld [vmem:[%s8152_s2 + $0x4a8] ss:$16 sps:$4 sm:$0xff]  }
  0x6f   : > { %1808 = vmatprep.subr.bf16.mxu0 %v5632_v33  ;;  %1972 = vmatprep.subr.bf16.mxu1 %v5635_v34  ;;  %v5727_v33 = vld [vmem:[%s8152_s2 + $0x4cc] ss:$16 sps:$4 sm:$0xff]   ;;  %v5722_v34 = vld [vmem:[%s8152_s2 + $0x4c0] ss:$16 sps:$4 sm:$0xff]  }
  0x72   : > { %1809 = vmatpush1.bf16.msra.mxu0 %v5630_v35  ;;  %1973 = vmatpush1.bf16.msra.mxu1 %v5633_v36  ;;  %v5725_v35 = vld [vmem:[%s8152_s2 + $0x4c8] ss:$16 sps:$4 sm:$0xff]   ;;  %v5730_v36 = vld [vmem:[%s8152_s2 + $0x4e4] ss:$16 sps:$4 sm:$0xff]  }
  0x73   : > { %1810 = vmatprep.subr.bf16.mxu0 %v5638_v37  ;;  %1974 = vmatprep.subr.bf16.mxu1 %v5641_v38  ;;  %v5733_v37 = vld [vmem:[%s8152_s2 + $0x4ec] ss:$16 sps:$4 sm:$0xff]   ;;  %v5728_v38 = vld [vmem:[%s8152_s2 + $0x4e0] ss:$16 sps:$4 sm:$0xff]  }
  0x76   : > { %1811 = vmatpush1.bf16.msra.mxu0 %v5636_v39  ;;  %1975 = vmatpush1.bf16.msra.mxu1 %v5639_v40  ;;  %v5731_v39 = vld [vmem:[%s8152_s2 + $0x4e8] ss:$16 sps:$4 sm:$0xff]   ;;  %v5736_v40 = vld [vmem:[%s8152_s2 + $0x504] ss:$16 sps:$4 sm:$0xff]  }
  0x77   : > { %1812 = vmatprep.subr.bf16.mxu0 %v5644_v41  ;;  %1976 = vmatprep.subr.bf16.mxu1 %v5647_v42  ;;  %v5739_v41 = vld [vmem:[%s8152_s2 + $0x50c] ss:$16 sps:$4 sm:$0xff]   ;;  %v5734_v42 = vld [vmem:[%s8152_s2 + $0x500] ss:$16 sps:$4 sm:$0xff]  }
  0x7a   : > { %1813 = vmatpush1.bf16.msra.mxu0 %v5642_v43  ;;  %1977 = vmatpush1.bf16.msra.mxu1 %v5645_v44  ;;  %v5737_v43 = vld [vmem:[%s8152_s2 + $0x508] ss:$16 sps:$4 sm:$0xff]   ;;  %v5742_v44 = vld [vmem:[%s8152_s2 + $0x524] ss:$16 sps:$4 sm:$0xff]  }
  0x7b   : > { %1814 = vmatprep.subr.bf16.mxu0 %v5650_v45  ;;  %1978 = vmatprep.subr.bf16.mxu1 %v5653_v46  ;;  %v5745_v45 = vld [vmem:[%s8152_s2 + $0x52c] ss:$16 sps:$4 sm:$0xff]   ;;  %v5740_v46 = vld [vmem:[%s8152_s2 + $0x520] ss:$16 sps:$4 sm:$0xff]  }
  0x7e   : > { %1815 = vmatpush1.bf16.msra.mxu0 %v5648_v47  ;;  %1979 = vmatpush1.bf16.msra.mxu1 %v5651_v48  ;;  %v5743_v47 = vld [vmem:[%s8152_s2 + $0x528] ss:$16 sps:$4 sm:$0xff]   ;;  %v5748_v48 = vld [vmem:[%s8152_s2 + $0x544] ss:$16 sps:$4 sm:$0xff]  }
  0x7f   : > { %1816 = vmatprep.subr.bf16.mxu0 %v5656_v49  ;;  %1980 = vmatprep.subr.bf16.mxu1 %v5659_v50  ;;  %v5751_v49 = vld [vmem:[%s8152_s2 + $0x54c] ss:$16 sps:$4 sm:$0xff]   ;;  %v5746_v50 = vld [vmem:[%s8152_s2 + $0x540] ss:$16 sps:$4 sm:$0xff]  }
  0x82   : > { %1817 = vmatpush1.bf16.msra.mxu0 %v5654_v51  ;;  %1981 = vmatpush1.bf16.msra.mxu1 %v5657_v52  ;;  %v5749_v51 = vld [vmem:[%s8152_s2 + $0x548] ss:$16 sps:$4 sm:$0xff]   ;;  %v5754_v52 = vld [vmem:[%s8152_s2 + $0x564] ss:$16 sps:$4 sm:$0xff]  }
  0x83   : > { %1818 = vmatprep.subr.bf16.mxu0 %v5662_v53  ;;  %1982 = vmatprep.subr.bf16.mxu1 %v5665_v54  ;;  %v5757_v53 = vld [vmem:[%s8152_s2 + $0x56c] ss:$16 sps:$4 sm:$0xff]   ;;  %v5752_v54 = vld [vmem:[%s8152_s2 + $0x560] ss:$16 sps:$4 sm:$0xff]  }
  0x86   : > { %1819 = vmatpush1.bf16.msra.mxu0 %v5660_v55  ;;  %1983 = vmatpush1.bf16.msra.mxu1 %v5663_v56  ;;  %v5755_v55 = vld [vmem:[%s8152_s2 + $0x568] ss:$16 sps:$4 sm:$0xff]   ;;  %v5760_v56 = vld [vmem:[%s8152_s2 + $0x584] ss:$16 sps:$4 sm:$0xff]  }
  0x87   : > { %1820 = vmatprep.subr.bf16.mxu0 %v5668_v57  ;;  %1984 = vmatprep.subr.bf16.mxu1 %v5671_v58  ;;  %v5763_v57 = vld [vmem:[%s8152_s2 + $0x58c] ss:$16 sps:$4 sm:$0xff]   ;;  %v5758_v58 = vld [vmem:[%s8152_s2 + $0x580] ss:$16 sps:$4 sm:$0xff]  }
  0x8a   : > { %1821 = vmatpush1.bf16.msra.mxu0 %v5666_v59  ;;  %1985 = vmatpush1.bf16.msra.mxu1 %v5669_v60  ;;  %v5761_v59 = vld [vmem:[%s8152_s2 + $0x588] ss:$16 sps:$4 sm:$0xff]   ;;  %v5766_v60 = vld [vmem:[%s8152_s2 + $0x5a4] ss:$16 sps:$4 sm:$0xff]  }
  0x8b   : > { %1822 = vmatprep.subr.bf16.mxu0 %v5674_v61  ;;  %1986 = vmatprep.subr.bf16.mxu1 %v5677_v62  ;;  %v5769_v61 = vld [vmem:[%s8152_s2 + $0x5ac] ss:$16 sps:$4 sm:$0xff]   ;;  %v5764_v62 = vld [vmem:[%s8152_s2 + $0x5a0] ss:$16 sps:$4 sm:$0xff]  }
  0x8e   : > { %1823 = vmatpush1.bf16.msra.mxu0 %v5672_v63  ;;  %1987 = vmatpush1.bf16.msra.mxu1 %v5675_v0  ;;  %v5767_v63 = vld [vmem:[%s8152_s2 + $0x5a8] ss:$16 sps:$4 sm:$0xff]   ;;  %v5772_v0 = vld [vmem:[%s8152_s2 + $0x5c4] ss:$16 sps:$4 sm:$0xff]  }
  0x8f   : > { %1824 = vmatprep.subr.bf16.mxu0 %v5680_v1  ;;  %1988 = vmatprep.subr.bf16.mxu1 %v5683_v2  ;;  %v5775_v1 = vld [vmem:[%s8152_s2 + $0x5cc] ss:$16 sps:$4 sm:$0xff]   ;;  %v5770_v2 = vld [vmem:[%s8152_s2 + $0x5c0] ss:$16 sps:$4 sm:$0xff]  }
  0x92   : > { %1825 = vmatpush1.bf16.msra.mxu0 %v5678_v3  ;;  %1989 = vmatpush1.bf16.msra.mxu1 %v5681_v4  ;;  %v5773_v3 = vld [vmem:[%s8152_s2 + $0x5c8] ss:$16 sps:$4 sm:$0xff]   ;;  %v5778_v4 = vld [vmem:[%s8152_s2 + $0x5e4] ss:$16 sps:$4 sm:$0xff]  }
  0x93   : > { %1835 = vmatprep.subr.bf16.mxu0 %v5688_v5  ;;  %1999 = vmatprep.subr.bf16.mxu1 %v5691_v6  ;;  %v5781_v5 = vld [vmem:[%s8152_s2 + $0x5ec] ss:$16 sps:$4 sm:$0xff]   ;;  %v5776_v6 = vld [vmem:[%s8152_s2 + $0x5e0] ss:$16 sps:$4 sm:$0xff]  }
  0x95   : > { %1827 = vmatmul.mubr.bf16.vlgmr.msra.gmra.mrb[0].mxu0 %v4851_v7  ;;  %1991 = vmatmul.mubr.bf16.vlgmr.msra.gmra.mrb[0].mxu1 %v4851_v7  ;;  %v5779_v7 = vld [vmem:[%s8152_s2 + $0x5e8] ss:$16 sps:$4 sm:$0xff]  }
  0x96   : > { %1836 = vmatpush1.bf16.msra.mxu0 %v5686_v8  ;;  %2000 = vmatpush1.bf16.msra.mxu1 %v5689_v9  ;;  %v5786_v8 = vld [vmem:[%s8152_s2 + $0x604] ss:$16 sps:$4 sm:$0xff]   ;;  %v5789_v9 = vld [vmem:[%s8152_s2 + $0x60c] ss:$16 sps:$4 sm:$0xff]  }
  0x97   : > { %1837 = vmatprep.subr.bf16.mxu0 %v5694_v10  ;;  %2001 = vmatprep.subr.bf16.mxu1 %v5697_v11  ;;  %v5784_v10 = vld [vmem:[%s8152_s2 + $0x600] ss:$16 sps:$4 sm:$0xff]   ;;  %v5787_v11 = vld [vmem:[%s8152_s2 + $0x608] ss:$16 sps:$4 sm:$0xff]  }
  0x98   : > { %1867 = vmatprep.mubr.bf16.mxu0 %v4854_v13  ;;  %2031 = vmatprep.mubr.bf16.mxu1 %v4854_v13  ;;  %v4853_v13 = vcombine.low %v6848_v12, %v6848_v12  ;;  %v5587_v12 = vld [vmem:[%s6567_s14 + $0x18] ss:$0 sps:$4 sm:$0xff]   ;;  %s520_s14 = scalar_lea.vmem %s8165_s15, %s4847_s30 }
  0x9a   : > { %1838 = vmatpush1.bf16.msra.mxu0 %v5692_v14  ;;  %2002 = vmatpush1.bf16.msra.mxu1 %v5695_v15  ;;  %v5792_v14 = vld [vmem:[%s8154_s4 + $0x4] ss:$8 sps:$4 sm:$0xff]   ;;  %v6296_v15 = vmov 0  }
  0x9b   : > { %1839 = vmatprep.subr.bf16.mxu0 %v5700_v16  ;;  %2003 = vmatprep.subr.bf16.mxu1 %v5703_v17  ;;  %v5790_v16 = vld [vmem:[%s8154_s4] ss:$8 sps:$4 sm:$0xff]   ;;  %v5795_v17 = vld [vmem:[%s8154_s4 + $0x14] ss:$8 sps:$4 sm:$0xff]  }
  0x9e   : > { %1840 = vmatpush1.bf16.msra.mxu0 %v5698_v18  ;;  %2004 = vmatpush1.bf16.msra.mxu1 %v5701_v19  ;;  %v5793_v18 = vld [vmem:[%s8154_s4 + $0x10] ss:$8 sps:$4 sm:$0xff]   ;;  %v5798_v19 = vld [vmem:[%s8154_s4 + $0x24] ss:$8 sps:$4 sm:$0xff]  }
  0x9f   : > { %1841 = vmatprep.subr.bf16.mxu0 %v5706_v20  ;;  %2005 = vmatprep.subr.bf16.mxu1 %v5709_v21  ;;  %v5796_v20 = vld [vmem:[%s8154_s4 + $0x20] ss:$8 sps:$4 sm:$0xff]   ;;  %v5801_v21 = vld [vmem:[%s8154_s4 + $0x34] ss:$8 sps:$4 sm:$0xff]  }
  0xa2   : > { %1842 = vmatpush1.bf16.msra.mxu0 %v5704_v22  ;;  %2006 = vmatpush1.bf16.msra.mxu1 %v5707_v23  ;;  %v5799_v22 = vld [vmem:[%s8154_s4 + $0x30] ss:$8 sps:$4 sm:$0xff]   ;;  %v5804_v23 = vld [vmem:[%s8154_s4 + $0x44] ss:$8 sps:$4 sm:$0xff]  }
  0xa3   : > { %1843 = vmatprep.subr.bf16.mxu0 %v5712_v24  ;;  %2007 = vmatprep.subr.bf16.mxu1 %v5715_v25  ;;  %v5802_v24 = vld [vmem:[%s8154_s4 + $0x40] ss:$8 sps:$4 sm:$0xff]   ;;  %v5807_v25 = vld [vmem:[%s8154_s4 + $0x54] ss:$8 sps:$4 sm:$0xff]  }
  0xa6   : > { %1844 = vmatpush1.bf16.msra.mxu0 %v5710_v26  ;;  %2008 = vmatpush1.bf16.msra.mxu1 %v5713_v27  ;;  %v5805_v26 = vld [vmem:[%s8154_s4 + $0x50] ss:$8 sps:$4 sm:$0xff]   ;;  %v5810_v27 = vld [vmem:[%s8154_s4 + $0x64] ss:$8 sps:$4 sm:$0xff]  }
  0xa7   : > { %1845 = vmatprep.subr.bf16.mxu0 %v5718_v28  ;;  %2009 = vmatprep.subr.bf16.mxu1 %v5721_v29  ;;  %v5808_v28 = vld [vmem:[%s8154_s4 + $0x60] ss:$8 sps:$4 sm:$0xff]   ;;  %v5813_v29 = vld [vmem:[%s8154_s4 + $0x74] ss:$8 sps:$4 sm:$0xff]  }
  0xaa   : > { %1846 = vmatpush1.bf16.msra.mxu0 %v5716_v30  ;;  %2010 = vmatpush1.bf16.msra.mxu1 %v5719_v31  ;;  %v5811_v30 = vld [vmem:[%s8154_s4 + $0x70] ss:$8 sps:$4 sm:$0xff]   ;;  %v5816_v31 = vld [vmem:[%s8154_s4 + $0x84] ss:$8 sps:$4 sm:$0xff]  }
  0xab   : > { %1847 = vmatprep.subr.bf16.mxu0 %v5724_v32  ;;  %2011 = vmatprep.subr.bf16.mxu1 %v5727_v33  ;;  %v5814_v32 = vld [vmem:[%s8154_s4 + $0x80] ss:$8 sps:$4 sm:$0xff]   ;;  %v5819_v33 = vld [vmem:[%s8154_s4 + $0x94] ss:$8 sps:$4 sm:$0xff]  }
  0xae   : > { %1848 = vmatpush1.bf16.msra.mxu0 %v5722_v34  ;;  %2012 = vmatpush1.bf16.msra.mxu1 %v5725_v35  ;;  %v5817_v34 = vld [vmem:[%s8154_s4 + $0x90] ss:$8 sps:$4 sm:$0xff]   ;;  %v5822_v35 = vld [vmem:[%s8154_s4 + $0xa4] ss:$8 sps:$4 sm:$0xff]  }
  0xaf   : > { %1849 = vmatprep.subr.bf16.mxu0 %v5730_v36  ;;  %2013 = vmatprep.subr.bf16.mxu1 %v5733_v37  ;;  %v5820_v36 = vld [vmem:[%s8154_s4 + $0xa0] ss:$8 sps:$4 sm:$0xff]   ;;  %v5825_v37 = vld [vmem:[%s8154_s4 + $0xb4] ss:$8 sps:$4 sm:$0xff]  }
  0xb2   : > { %1850 = vmatpush1.bf16.msra.mxu0 %v5728_v38  ;;  %2014 = vmatpush1.bf16.msra.mxu1 %v5731_v39  ;;  %v5823_v38 = vld [vmem:[%s8154_s4 + $0xb0] ss:$8 sps:$4 sm:$0xff]   ;;  %v5828_v39 = vld [vmem:[%s8154_s4 + $0xc4] ss:$8 sps:$4 sm:$0xff]  }
  0xb3   : > { %1851 = vmatprep.subr.bf16.mxu0 %v5736_v40  ;;  %2015 = vmatprep.subr.bf16.mxu1 %v5739_v41  ;;  %v5826_v40 = vld [vmem:[%s8154_s4 + $0xc0] ss:$8 sps:$4 sm:$0xff]   ;;  %v5831_v41 = vld [vmem:[%s8154_s4 + $0xd4] ss:$8 sps:$4 sm:$0xff]  }
  0xb6   : > { %1852 = vmatpush1.bf16.msra.mxu0 %v5734_v42  ;;  %2016 = vmatpush1.bf16.msra.mxu1 %v5737_v43  ;;  %v5829_v42 = vld [vmem:[%s8154_s4 + $0xd0] ss:$8 sps:$4 sm:$0xff]   ;;  %v5834_v43 = vld [vmem:[%s8154_s4 + $0xe4] ss:$8 sps:$4 sm:$0xff]  }
  0xb7   : > { %1853 = vmatprep.subr.bf16.mxu0 %v5742_v44  ;;  %2017 = vmatprep.subr.bf16.mxu1 %v5745_v45  ;;  %v5832_v44 = vld [vmem:[%s8154_s4 + $0xe0] ss:$8 sps:$4 sm:$0xff]   ;;  %v5837_v45 = vld [vmem:[%s8154_s4 + $0xf4] ss:$8 sps:$4 sm:$0xff]  }
  0xba   : > { %1854 = vmatpush1.bf16.msra.mxu0 %v5740_v46  ;;  %2018 = vmatpush1.bf16.msra.mxu1 %v5743_v47  ;;  %v5835_v46 = vld [vmem:[%s8154_s4 + $0xf0] ss:$8 sps:$4 sm:$0xff]   ;;  %v5840_v47 = vld [vmem:[%s8154_s4 + $0x104] ss:$8 sps:$4 sm:$0xff]  }
  0xbb   : > { %1855 = vmatprep.subr.bf16.mxu0 %v5748_v48  ;;  %2019 = vmatprep.subr.bf16.mxu1 %v5751_v49  ;;  %v5865_v48 = vld [vmem:[%s8156_s6] sm:$0xff]   ;;  %v5866_v49 = vld [vmem:[%s8156_s6 + $0x8] sm:$0xff]  }
  0xbe   : > { %1856 = vmatpush1.bf16.msra.mxu0 %v5746_v50  ;;  %2020 = vmatpush1.bf16.msra.mxu1 %v5749_v51  ;;  %v5867_v50 = vld [vmem:[%s8156_s6 + $0x10] sm:$0xff]   ;;  %v5868_v51 = vld [vmem:[%s8156_s6 + $0x18] sm:$0xff]  }
  0xbf   : > { %1857 = vmatprep.subr.bf16.mxu0 %v5754_v52  ;;  %2021 = vmatprep.subr.bf16.mxu1 %v5757_v53  ;;  %v5869_v52 = vld [vmem:[%s8156_s6 + $0x20] sm:$0xff]   ;;  %v5870_v53 = vld [vmem:[%s8156_s6 + $0x28] sm:$0xff]  }
  0xc2   : > { %1858 = vmatpush1.bf16.msra.mxu0 %v5752_v54  ;;  %2022 = vmatpush1.bf16.msra.mxu1 %v5755_v55  ;;  %v5871_v54 = vld [vmem:[%s8156_s6 + $0x30] sm:$0xff]   ;;  %v5872_v55 = vld [vmem:[%s8156_s6 + $0x38] sm:$0xff]  }
  0xc3   : > { %1859 = vmatprep.subr.bf16.mxu0 %v5760_v56  ;;  %2023 = vmatprep.subr.bf16.mxu1 %v5763_v57  ;;  %v5873_v56 = vld [vmem:[%s8156_s6 + $0x40] sm:$0xff]   ;;  %v5874_v57 = vld [vmem:[%s8156_s6 + $0x48] sm:$0xff]  }
  0xc6   : > { %1860 = vmatpush1.bf16.msra.mxu0 %v5758_v58  ;;  %2024 = vmatpush1.bf16.msra.mxu1 %v5761_v59  ;;  %v5875_v58 = vld [vmem:[%s8156_s6 + $0x50] sm:$0xff]   ;;  %v725_v59 = vlaneseq }
  0xc7   : > { %1861 = vmatprep.subr.bf16.mxu0 %v5766_v60  ;;  %2025 = vmatprep.subr.bf16.mxu1 %v5769_v61 }
  0xc8   : > { %v7189_v60 = vshrl.u32 %v725_v59, 7 }
  0xca   : > { %1862 = vmatpush1.bf16.msra.mxu0 %v5764_v62  ;;  %2026 = vmatpush1.bf16.msra.mxu1 %v5767_v63  ;;  %v7192_v61 = vsub.s32 0, %v7189_v60  ;;  %v723_v62 = vld [vmem:[%s8153_s3] sm:$0xf]  ;;  %v7198_v63 = vsub.s32 1, %v7189_v60 }
  0xcb   : > { %1863 = vmatprep.subr.bf16.mxu0 %v5772_v0  ;;  %2027 = vmatprep.subr.bf16.mxu1 %v5775_v1  ;;  %v7201_v0 = vsub.s32 3, %v7189_v60 }
  0xcc   : > { %v728_v1 = vrot.slane %v723_v62, %v7192_v61 }
  0xce   : > { %1864 = vmatpush1.bf16.msra.mxu0 %v5770_v2  ;;  %2028 = vmatpush1.bf16.msra.mxu1 %v5773_v3  ;;  %v732_v2 = vrot.slane %v723_v62, %v7198_v63  ;;  %v740_v3 = vrot.slane %v723_v62, %v7201_v0 }
  0xcf   : > { %1865 = vmatprep.subr.bf16.mxu0 %v5778_v4  ;;  %2029 = vmatprep.subr.bf16.mxu1 %v5781_v5 }
  0xd2   : > { %1866 = vmatpush1.bf16.msra.mxu0 %v5776_v6  ;;  %2030 = vmatpush1.bf16.msra.mxu1 %v5779_v7 }
  0xd3   : > { %1876 = vmatprep.subr.bf16.mxu0 %v5786_v8  ;;  %2040 = vmatprep.subr.bf16.mxu1 %v5789_v9 }
  0xd5   : > { %1868 = vmatmul.mubr.bf16.vlgmr.msra.gmra.mrb[0].mxu0 %v4853_v13  ;;  %2032 = vmatmul.mubr.bf16.vlgmr.msra.gmra.mrb[0].mxu1 %v4853_v13 }
  0xd6   : > { %1877 = vmatpush1.bf16.msra.mxu0 %v5784_v10  ;;  %2041 = vmatpush1.bf16.msra.mxu1 %v5787_v11 }
  0xd7   : > { %1908 = vmatprep.mubr.bf16.mxu0 %v6296_v15  ;;  %2072 = vmatprep.mubr.bf16.mxu1 %v6296_v15 }
  0xd8   : > { %2404 = vmatprep.subr.bf16.mxu0 %v5792_v14  ;;  %2605 = vmatprep.subr.bf16.mxu1 %v6296_v15 }
  0xe1   : > { %5052 = vmatmul.mubr.msk.bf16.vlgmr.msra.gmra.mrb[0].mxu0 %vm1749_vm0, %v5587_v12  ;;  %5053 = vmatmul.mubr.msk.bf16.vlgmr.msra.gmra.mrb[0].mxu1 %vm1749_vm0, %v5587_v12 }
  0xe2   : > { %2405 = vmatpush1.bf16.msra.mxu0 %v5790_v16  ;;  %2606 = vmatpush1.bf16.msra.mxu1 %v5865_v48  ;;  %v2139_v48 = vld [vmem:[%s8155_s5] sm:$0x3] }
  0xe3   : > { %2406 = vmatprep.subr.bf16.mxu0 %v5795_v17  ;;  %2607 = vmatprep.subr.bf16.mxu1 %v6296_v15 }
  0xe6   : > { %2407 = vmatpush1.bf16.msra.mxu0 %v5793_v18  ;;  %2608 = vmatpush1.bf16.msra.mxu1 %v5866_v49  ;;  %v2144_v49 = vrot.slane %v2139_v48, %v7192_v61 }
  0xe7   : > { %2408 = vmatprep.subr.bf16.mxu0 %v5798_v19  ;;  %2609 = vmatprep.subr.bf16.mxu1 %v6296_v15 }
  0xea   : > { %2409 = vmatpush1.bf16.msra.mxu0 %v5796_v20  ;;  %2610 = vmatpush1.bf16.msra.mxu1 %v5867_v50  ;;  %v5838_v20 = vld [vmem:[%s8154_s4 + $0x100] ss:$8 sps:$4 sm:$0xff]   ;;  %v2148_v50 = vrot.slane %v2139_v48, %v7198_v63 }
  0xeb   : > { %2410 = vmatprep.subr.bf16.mxu0 %v5801_v21  ;;  %2611 = vmatprep.subr.bf16.mxu1 %v6296_v15 }
  0xee   : > { %2411 = vmatpush1.bf16.msra.mxu0 %v5799_v22  ;;  %2612 = vmatpush1.bf16.msra.mxu1 %v5868_v51  ;;  %v5843_v22 = vld [vmem:[%s8154_s4 + $0x114] ss:$8 sps:$4 sm:$0xff]  }
  0xef   : > { %2412 = vmatprep.subr.bf16.mxu0 %v5804_v23  ;;  %2613 = vmatprep.subr.bf16.mxu1 %v6296_v15 }
  0xf2   : > { %2413 = vmatpush1.bf16.msra.mxu0 %v5802_v24  ;;  %2614 = vmatpush1.bf16.msra.mxu1 %v5869_v52  ;;  %v5841_v24 = vld [vmem:[%s8154_s4 + $0x110] ss:$8 sps:$4 sm:$0xff]  }
  0xf3   : > { %2414 = vmatprep.subr.bf16.mxu0 %v5807_v25  ;;  %2615 = vmatprep.subr.bf16.mxu1 %v6296_v15  ;;  %v5846_v25 = vld [vmem:[%s8154_s4 + $0x124] ss:$8 sps:$4 sm:$0xff]  }
  0xf6   : > { %2415 = vmatpush1.bf16.msra.mxu0 %v5805_v26  ;;  %2616 = vmatpush1.bf16.msra.mxu1 %v5870_v53  ;;  %v5844_v26 = vld [vmem:[%s8154_s4 + $0x120] ss:$8 sps:$4 sm:$0xff]  }
  0xf7   : > { %2416 = vmatprep.subr.bf16.mxu0 %v5810_v27  ;;  %2617 = vmatprep.subr.bf16.mxu1 %v6296_v15  ;;  %v5849_v27 = vld [vmem:[%s8154_s4 + $0x134] ss:$8 sps:$4 sm:$0xff]  }
  0xfa   : > { %2417 = vmatpush1.bf16.msra.mxu0 %v5808_v28  ;;  %2618 = vmatpush1.bf16.msra.mxu1 %v5871_v54  ;;  %v5847_v28 = vld [vmem:[%s8154_s4 + $0x130] ss:$8 sps:$4 sm:$0xff]  }
  0xfb   : > { %2418 = vmatprep.subr.bf16.mxu0 %v5813_v29  ;;  %2619 = vmatprep.subr.bf16.mxu1 %v6296_v15  ;;  %v5852_v29 = vld [vmem:[%s8154_s4 + $0x144] ss:$8 sps:$4 sm:$0xff]  }
  0xfe   : > { %2419 = vmatpush1.bf16.msra.mxu0 %v5811_v30  ;;  %2620 = vmatpush1.bf16.msra.mxu1 %v5872_v55  ;;  %v5850_v30 = vld [vmem:[%s8154_s4 + $0x140] ss:$8 sps:$4 sm:$0xff]  }
  0xff   : > { %2420 = vmatprep.subr.bf16.mxu0 %v5816_v31  ;;  %2621 = vmatprep.subr.bf16.mxu1 %v6296_v15  ;;  %v5855_v31 = vld [vmem:[%s8154_s4 + $0x154] ss:$8 sps:$4 sm:$0xff]  }
 0x102   : > { %2421 = vmatpush1.bf16.msra.mxu0 %v5814_v32  ;;  %2622 = vmatpush1.bf16.msra.mxu1 %v5873_v56  ;;  %v5853_v32 = vld [vmem:[%s8154_s4 + $0x150] ss:$8 sps:$4 sm:$0xff]  }
 0x103   : > { %2422 = vmatprep.subr.bf16.mxu0 %v5819_v33  ;;  %2623 = vmatprep.subr.bf16.mxu1 %v6296_v15  ;;  %v7244_v33 = vsub.s32 2, %v7189_v60 }
 0x106   : > { %2423 = vmatpush1.bf16.msra.mxu0 %v5817_v34  ;;  %2624 = vmatpush1.bf16.msra.mxu1 %v5874_v57  ;;  %v5858_v34 = vld [vmem:[%s8154_s4 + $0x164] ss:$8 sps:$4 sm:$0xff]  }
 0x107   : > { %2424 = vmatprep.subr.bf16.mxu0 %v5822_v35  ;;  %2625 = vmatprep.subr.bf16.mxu1 %v6296_v15  ;;  %v5856_v35 = vld [vmem:[%s8154_s4 + $0x160] ss:$8 sps:$4 sm:$0xff]  }
 0x10a   : > { %2425 = vmatpush1.bf16.msra.mxu0 %v5820_v36  ;;  %2626 = vmatpush1.bf16.msra.mxu1 %v5875_v58  ;;  %v736_v36 = vrot.slane %v723_v62, %v7244_v33 }
 0x10b   : > { %2426 = vmatprep.subr.bf16.mxu0 %v5825_v37  ;;  %2627 = vmatprep.subr.bf16.mxu1 %v6296_v15  ;;  %v5861_v37 = vld [vmem:[%s8154_s4 + $0x174] ss:$8 sps:$4 sm:$0xff]  }
 0x10e   : > { %2427 = vmatpush1.bf16.msra.mxu0 %v5823_v38  ;;  %v5859_v38 = vld [vmem:[%s8154_s4 + $0x170] ss:$8 sps:$4 sm:$0xff]  }
 0x10f   : > { %2428 = vmatprep.subr.bf16.mxu0 %v5828_v39 }
 0x112   : > { %2429 = vmatpush1.bf16.msra.mxu0 %v5826_v40  ;;  %v5864_v40 = vld [vmem:[%s8154_s4 + $0x184] ss:$8 sps:$4 sm:$0xff]  }
 0x113   : > { %2430 = vmatprep.subr.bf16.mxu0 %v5831_v41  ;;  %v5862_v41 = vld [vmem:[%s8154_s4 + $0x180] ss:$8 sps:$4 sm:$0xff]  }
 0x116   : > { %2431 = vmatpush1.bf16.msra.mxu0 %v5829_v42 }
 0x117   : > { %2432 = vmatprep.subr.bf16.mxu0 %v5834_v43 }
 0x11a   : > { %2433 = vmatpush1.bf16.msra.mxu0 %v5832_v44  ;;  %v5876_v44 = vld [vmem:[%s8156_s6 + $0x58] sm:$0xff]  }
 0x11b   : > { %2434 = vmatprep.subr.bf16.mxu0 %v5837_v45  ;;  %2628 = vmatpush1.bf16.msra.mxu1 %v5876_v44  ;;  %v5877_v45 = vld [vmem:[%s8156_s6 + $0x60] ss:$0 sps:$4 sm:$0xff]   ;;  %v5953_v44 = vld [vmem:[%s8160_s10 + $0x148] ss:$16 sps:$4 sm:$0xff]  }
 0x11c   : > { %2629 = vmatprep.subr.bf16.mxu1 %v6296_v15 }
 0x11e   : > { %2435 = vmatpush1.bf16.msra.mxu0 %v5835_v46  ;;  %v2603_v46 = vsel %vm2601_vm1, %v5877_v45, 0 }
 0x11f   : > { %2445 = vmatprep.subr.bf16.mxu0 %v5840_v47  ;;  %2630 = vmatpush1.bf16.msra.mxu1 %v2603_v46  ;;  %v2649_v47 = vld [vmem:[%s516_s23] sm:$0xff] }
 0x120   : > { %2651 = vrot.lane.b32.xlu0 %v2649_v47, %s6297_s25  ;;  %v5890_v47 = vld [vmem:[%s8160_s10] ss:$16 sps:$4 sm:$0xff]  }
 0x1b4   : > { %v1910_v4 = vpop.f32.mrb[0].mxu0  ;;  %v2074_v5 = vpop.f32.mrb[0].mxu1 }
 0x1b5   : > { %v5393_v6 = vadd.f32 %v1910_v4, %v728_v1  ;;  %v1912_v7 = vpop.f32.mrb[1].mxu0  ;;  %v2076_v8 = vpop.f32.mrb[1].mxu1  ;;  %v5395_v39 = vadd.f32 %v2074_v5, %v736_v36  ;;  %v5878_v1 = vld [vmem:[%s8158_s8] ss:$8 sps:$4 sm:$0xff]   ;;  %v5881_v4 = vld [vmem:[%s8158_s8 + $0x10] ss:$8 sps:$4 sm:$0xff]  }
 0x1b6   : > { %v5394_v9 = vadd.f32 %v1912_v7, %v732_v2  ;;  %v5396_v10 = vadd.f32 %v2076_v8, %v740_v3  ;;  %v1914_v11 = vpop.f32.mrb[2].mxu0  ;;  %v2078_v13 = vpop.f32.mrb[2].mxu1  ;;  %v5880_v2 = vld [vmem:[%s8158_s8 + $0x4] ss:$8 sps:$4 sm:$0xff]   ;;  %v5883_v3 = vld [vmem:[%s8158_s8 + $0x14] ss:$8 sps:$4 sm:$0xff]  }
 0x1b7   : > { %v2081_v14 = vpack.c.bf16 %v5393_v6, %v5393_v6  ;;  %v1915_v12 = vpop.f32.mrb[3].mxu0  ;;  %v2079_v16 = vpop.f32.mrb[3].mxu1  ;;  %v2083_v42 = vpack.c.bf16 %v5395_v39, %v5395_v39  ;;  %2725 = vmatprep.subr.bf16.mxu1 %v5880_v2  ;;  %v5886_v5 = vld [vmem:[%s8158_s8 + $0x24] ss:$8 sps:$4 sm:$0xff]   ;;  %v5884_v6 = vld [vmem:[%s8158_s8 + $0x20] ss:$8 sps:$4 sm:$0xff]  }
 0x1b8   : > { %v2082_v17 = vpack.c.bf16 %v5394_v9, %v5394_v9  ;;  %v2084_v18 = vpack.c.bf16 %v5396_v10, %v5396_v10  ;;  %v5105_v7 = vld [vmem:[%s8157_s7] ss:$0 sm:$0xff]  ;;  %v5889_v16 = vld [vmem:[%s8158_s8 + $0x34] ss:$8 sps:$4 sm:$0xff]   ;;  %v5929_v36 = vld [vmem:[%s8160_s10 + $0xc8] ss:$16 sps:$4 sm:$0xff]  }
 0x1b9   : > { %v2085_v21 = vmax.bf16 %v6296_v15, %v2081_v14  ;;  %v2087_v43 = vmax.bf16 %v6296_v15, %v2083_v42  ;;  %v5943_v39 = vld [vmem:[%s8160_s10 + $0x10c] ss:$16 sps:$4 sm:$0xff]   ;;  %v5947_v42 = vld [vmem:[%s8160_s10 + $0x128] ss:$16 sps:$4 sm:$0xff]   ;;  %v5932_v2 = vld [vmem:[%s8160_s10 + $0xe0] ss:$16 sps:$4 sm:$0xff]  }
 0x1ba   : > { %v2086_v19 = vmax.bf16 %v6296_v15, %v2082_v17  ;;  %v2088_v23 = vmax.bf16 %v6296_v15, %v2084_v18  ;;  %v5887_v17 = vld [vmem:[%s8158_s8 + $0x30] ss:$8 sps:$4 sm:$0xff]   ;;  %v5892_v18 = vld [vmem:[%s8160_s10 + $0x4] ss:$16 sps:$4 sm:$0xff]  }
 0x1bc   : > { %2436 = vmatprep.mubr.bf16.mxu0 %v2086_v19  ;;  %v5893_v19 = vld [vmem:[%s8160_s10 + $0x8] ss:$16 sps:$4 sm:$0xff]  }
 0x1bd   : > { %2437 = vmatmul.mubr.bf16.vlgmr.msra.gmra.mrb[4].mxu0 %v2085_v21  ;;  %v5901_v21 = vld [vmem:[%s8160_s10 + $0x2c] ss:$16 sps:$4 sm:$0xff]  }
 0x1be   : > { %2446 = vmatpush1.bf16.msra.mxu0 %v5838_v20  ;;  %5104 = vmatprep.mubr.msk.bf16.mxu0 %vm1749_vm0, %v2088_v23  ;;  %v5895_v20 = vld [vmem:[%s8160_s10 + $0xc] ss:$16 sps:$4 sm:$0xff]   ;;  %v5899_v23 = vld [vmem:[%s8160_s10 + $0x28] ss:$16 sps:$4 sm:$0xff]  }
 0x1bf   : > { %2447 = vmatprep.subr.bf16.mxu0 %v5843_v22  ;;  %v2652_v22 = vpop.permute.xlu0 %2651 }
 0x1c2   : > { %2448 = vmatpush1.bf16.msra.mxu0 %v5841_v24 }
 0x1c3   : > { %2449 = vmatprep.subr.bf16.mxu0 %v5846_v25  ;;  %v5907_v25 = vld [vmem:[%s8160_s10 + $0x4c] ss:$16 sps:$4 sm:$0xff]  }
 0x1c6   : > { %2450 = vmatpush1.bf16.msra.mxu0 %v5844_v26 }
 0x1c7   : > { %2451 = vmatprep.subr.bf16.mxu0 %v5849_v27  ;;  %v5905_v27 = vld [vmem:[%s8160_s10 + $0x48] ss:$16 sps:$4 sm:$0xff]  }
 0x1ca   : > { %2452 = vmatpush1.bf16.msra.mxu0 %v5847_v28  ;;  %v5913_v28 = vld [vmem:[%s8160_s10 + $0x6c] ss:$16 sps:$4 sm:$0xff]  }
 0x1cb   : > { %2453 = vmatprep.subr.bf16.mxu0 %v5852_v29  ;;  %v5911_v29 = vld [vmem:[%s8160_s10 + $0x68] ss:$16 sps:$4 sm:$0xff]  }
 0x1ce   : > { %2454 = vmatpush1.bf16.msra.mxu0 %v5850_v30  ;;  %v5919_v30 = vld [vmem:[%s8160_s10 + $0x8c] ss:$16 sps:$4 sm:$0xff]  }
 0x1cf   : > { %2455 = vmatprep.subr.bf16.mxu0 %v5855_v31  ;;  %v5917_v31 = vld [vmem:[%s8160_s10 + $0x88] ss:$16 sps:$4 sm:$0xff]  }
 0x1d2   : > { %2456 = vmatpush1.bf16.msra.mxu0 %v5853_v32  ;;  %v5925_v32 = vld [vmem:[%s8160_s10 + $0xac] ss:$16 sps:$4 sm:$0xff]  }
 0x1d3   : > { %2457 = vmatprep.subr.bf16.mxu0 %v5858_v34  ;;  %v5923_v34 = vld [vmem:[%s8160_s10 + $0xa8] ss:$16 sps:$4 sm:$0xff]  }
 0x1d6   : > { %2458 = vmatpush1.bf16.msra.mxu0 %v5856_v35  ;;  %v5931_v35 = vld [vmem:[%s8160_s10 + $0xcc] ss:$16 sps:$4 sm:$0xff]  }
 0x1d7   : > { %2459 = vmatprep.subr.bf16.mxu0 %v5861_v37  ;;  %v5937_v37 = vld [vmem:[%s8160_s10 + $0xec] ss:$16 sps:$4 sm:$0xff]  }
 0x1da   : > { %2460 = vmatpush1.bf16.msra.mxu0 %v5859_v38  ;;  %v5935_v38 = vld [vmem:[%s8160_s10 + $0xe8] ss:$16 sps:$4 sm:$0xff]  }
 0x1db   : > { %2461 = vmatprep.subr.bf16.mxu0 %v5864_v40  ;;  %v5941_v40 = vld [vmem:[%s8160_s10 + $0x108] ss:$16 sps:$4 sm:$0xff]  }
 0x1de   : > { %2462 = vmatpush1.bf16.msra.mxu0 %v5862_v41  ;;  %v5949_v41 = vld [vmem:[%s8160_s10 + $0x12c] ss:$16 sps:$4 sm:$0xff]  }
 0x1df   : > { %3148 = vmatprep.subr.bf16.mxu0 %v5895_v20 }
 0x1e1   : > { %2478 = vmatmul.mubr.bf16.vlgmr.msra.gmra.mrb[4].mxu0 %v2087_v43  ;;  %v5955_v43 = vld [vmem:[%s8160_s10 + $0x14c] ss:$16 sps:$4 sm:$0xff]  }
 0x1e2   : > { %3149 = vmatpush1.bf16.msra.mxu0 %v5893_v19 }
 0x1e3   : > { %3150 = vmatprep.subr.bf16.mxu0 %v5901_v21 }
 0x1e6   : > { %3151 = vmatpush1.bf16.msra.mxu0 %v5899_v23  ;;  %v5971_v23 = vld [vmem:[%s8162_s12 + $0xc] ss:$28 sps:$4 sm:$0xff]  }
 0x1e7   : > { %3152 = vmatprep.subr.bf16.mxu0 %v5907_v25 }
 0x1ea   : > { %3153 = vmatpush1.bf16.msra.mxu0 %v5905_v27 }
 0x1eb   : > { %3154 = vmatprep.subr.bf16.mxu0 %v5913_v28 }
 0x1ee   : > { %3155 = vmatpush1.bf16.msra.mxu0 %v5911_v29 }
 0x1ef   : > { %3156 = vmatprep.subr.bf16.mxu0 %v5919_v30 }
 0x1f2   : > { %3157 = vmatpush1.bf16.msra.mxu0 %v5917_v31 }
 0x1f3   : > { %3158 = vmatprep.subr.bf16.mxu0 %v5925_v32 }
 0x1f6   : > { %3159 = vmatpush1.bf16.msra.mxu0 %v5923_v34 }
 0x1f7   : > { %3160 = vmatprep.subr.bf16.mxu0 %v5931_v35 }
 0x1fa   : > { %3161 = vmatpush1.bf16.msra.mxu0 %v5929_v36 }
 0x1fb   : > { %3162 = vmatprep.subr.bf16.mxu0 %v5937_v37  ;;  %v5966_v37 = vld [vmem:[%s8162_s12] ss:$28 sps:$4 sm:$0xff]  }
 0x1fe   : > { %3163 = vmatpush1.bf16.msra.mxu0 %v5935_v38  ;;  %v5969_v38 = vld [vmem:[%s8162_s12 + $0x8] ss:$28 sps:$4 sm:$0xff]  }
 0x1ff   : > { %3164 = vmatprep.subr.bf16.mxu0 %v5943_v39 }
 0x202   : > { %3165 = vmatpush1.bf16.msra.mxu0 %v5941_v40  ;;  %v5974_v40 = vld [vmem:[%s8162_s12 + $0x3c] ss:$28 sps:$4 sm:$0xff]  }
 0x203   : > { %3166 = vmatprep.subr.bf16.mxu0 %v5949_v41  ;;  %v5977_v41 = vld [vmem:[%s8162_s12 + $0x44] ss:$28 sps:$4 sm:$0xff]  }
 0x206   : > { %3167 = vmatpush1.bf16.msra.mxu0 %v5947_v42  ;;  %v5972_v42 = vld [vmem:[%s8162_s12 + $0x38] ss:$28 sps:$4 sm:$0xff]  }
 0x207   : > { %3168 = vmatprep.subr.bf16.mxu0 %v5955_v43  ;;  %v5975_v43 = vld [vmem:[%s8162_s12 + $0x40] ss:$28 sps:$4 sm:$0xff]  }
 0x20a   : > { %3169 = vmatpush1.bf16.msra.mxu0 %v5953_v44  ;;  %v5980_v44 = vld [vmem:[%s8162_s12 + $0x74] ss:$28 sps:$4 sm:$0xff]  }
 0x2b4   : > { %v2479_v51 = vpop.f32.mrb[4].mxu0 }
 0x2b5   : > { %v5397_v52 = vadd.f32 %v2479_v51, %v2144_v49  ;;  %v2481_v53 = vpop.f32.mrb[5].mxu0  ;;  %v5898_v49 = vld [vmem:[%s8160_s10 + $0x24] ss:$16 sps:$4 sm:$0xff]  }
 0x2b6   : > { %v5398_v54 = vadd.f32 %v2481_v53, %v2148_v50  ;;  %v2483_v55 = vpop.f32.mrb[6].mxu0  ;;  %v5896_v50 = vld [vmem:[%s8160_s10 + $0x20] ss:$16 sps:$4 sm:$0xff]   ;;  %v5904_v51 = vld [vmem:[%s8160_s10 + $0x44] ss:$16 sps:$4 sm:$0xff]  }
 0x2b7   : > { %v2486_v56 = vpack.c.bf16 %v5397_v52, %v5397_v52  ;;  %v2484_v57 = vpop.f32.mrb[7].mxu0  ;;  %v5902_v52 = vld [vmem:[%s8160_s10 + $0x40] ss:$16 sps:$4 sm:$0xff]   ;;  %v5910_v53 = vld [vmem:[%s8160_s10 + $0x64] ss:$16 sps:$4 sm:$0xff]  }
 0x2b8   : > { %v2487_v58 = vpack.c.bf16 %v5398_v54, %v5398_v54  ;;  %v5908_v54 = vld [vmem:[%s8160_s10 + $0x60] ss:$16 sps:$4 sm:$0xff]   ;;  %v5916_v55 = vld [vmem:[%s8160_s10 + $0x84] ss:$16 sps:$4 sm:$0xff]  }
 0x2b9   : > { %v2488_v62 = vmax.bf16 %v6296_v15, %v2486_v56  ;;  %v5914_v56 = vld [vmem:[%s8160_s10 + $0x80] ss:$16 sps:$4 sm:$0xff]   ;;  %v5922_v57 = vld [vmem:[%s8160_s10 + $0xa4] ss:$16 sps:$4 sm:$0xff]  }
 0x2ba   : > { %v2489_v59 = vmax.bf16 %v6296_v15, %v2487_v58  ;;  %v5920_v58 = vld [vmem:[%s8160_s10 + $0xa0] ss:$16 sps:$4 sm:$0xff]  }
 0x2bc   : > { %5119 = vmatprep.mubr.msk.bf16.mxu1 %vm2597_vm2, %v2489_v59  ;;  %v5928_v59 = vld [vmem:[%s8160_s10 + $0xc4] ss:$16 sps:$4 sm:$0xff]  }
 0x2bd   : > { %2638 = vmatmul.mubr.bf16.vlgmr.msra.gmra.mrb[4].mxu1 %v2488_v62  ;;  %v5926_v62 = vld [vmem:[%s8160_s10 + $0xc0] ss:$16 sps:$4 sm:$0xff]  }
 0x2be   : > { %2757 = vmatprep.mubr.bf16.mxu1 %v6296_v15  ;;  %2726 = vmatpush1.bf16.msra.mxu1 %v5878_v1  ;;  %v5934_v1 = vld [vmem:[%s8160_s10 + $0xe4] ss:$16 sps:$4 sm:$0xff]  }
 0x2bf   : > { %2727 = vmatprep.subr.bf16.mxu1 %v5883_v3  ;;  %v5940_v3 = vld [vmem:[%s8160_s10 + $0x104] ss:$16 sps:$4 sm:$0xff]  }
 0x2c2   : > { %2728 = vmatpush1.bf16.msra.mxu1 %v5881_v4  ;;  %v5938_v4 = vld [vmem:[%s8160_s10 + $0x100] ss:$16 sps:$4 sm:$0xff]  }
 0x2c3   : > { %2729 = vmatprep.subr.bf16.mxu1 %v5886_v5  ;;  %v5946_v5 = vld [vmem:[%s8160_s10 + $0x124] ss:$16 sps:$4 sm:$0xff]  }
 0x2c6   : > { %2730 = vmatpush1.bf16.msra.mxu1 %v5884_v6  ;;  %v5944_v6 = vld [vmem:[%s8160_s10 + $0x120] ss:$16 sps:$4 sm:$0xff]  }
 0x2c7   : > { %2731 = vmatprep.subr.bf16.mxu1 %v5889_v16 }
 0x2ca   : > { %2732 = vmatpush1.bf16.msra.mxu1 %v5887_v17 }
 0x2cb   : > { %3107 = vmatprep.subr.bf16.mxu1 %v5892_v18 }
 0x390   : > { %v2639_v8 = vpop.f32.mrb[4].mxu1 }
 0x391   : > { %v7316_v9 = vadd.f32 %v5105_v7, %v2639_v8  ;;  %v2641_v10 = vpop.f32.mrb[5].mxu1  ;;  %v5952_v7 = vld [vmem:[%s8160_s10 + $0x144] ss:$16 sps:$4 sm:$0xff]   ;;  %v5950_v8 = vld [vmem:[%s8160_s10 + $0x140] ss:$16 sps:$4 sm:$0xff]  }
 0x392   : > { %v2642_v11 = vpop.f32.mrb[6].mxu1  ;;  %v5961_v10 = vld [vmem:[%s8160_s10 + $0x16c] ss:$16 sps:$4 sm:$0xff]  }
 0x393   : > { %2645 = vst [vmem:[%s520_s14] sm:$0xff] %v7316_v9  ;;  %v2646_v13 = vmul.f32 0.5, %v7316_v9  ;;  %v2643_v14 = vpop.f32.mrb[7].mxu1  ;;  %v5956_v11 = vld [vmem:[%s8160_s10 + $0x160] ss:$16 sps:$4 sm:$0xff]   ;;  %3170 = vmatprep.subr.bf16.mxu0 %v5961_v10 }
 0x394   : > { %v2818_v14 = vld [vmem:[%s8160_s10 + $0x180] sm:$0xff] }
 0x395   : > { %v2647_v12 = vmul.f32 1.442695, %v2646_v13  ;;  %v5959_v13 = vld [vmem:[%s8160_s10 + $0x168] ss:$16 sps:$4 sm:$0xff]   ;;  %v5178_v16 = vcombine.high %v2818_v14, %v2818_v14  ;;  %v5177_v18 = vcombine.low %v2818_v14, %v2818_v14  ;;  %v6014_v10 = vld [vmem:[%s8162_s12 + $0x1c0] ss:$28 sps:$4 sm:$0xff]  }
 0x396   : > { %3171 = vmatpush1.bf16.msra.mxu0 %v5959_v13  ;;  %v6022_v13 = vld [vmem:[%s8162_s12 + $0x1fc] ss:$28 sps:$4 sm:$0xff]   ;;  %v6025_v14 = vld [vmem:[%s8162_s12 + $0x204] ss:$28 sps:$4 sm:$0xff]  }
 0x397   : > { %6216 = vpow2.f32 %v2647_v12  ;;  %v2819_v12 = vld [vmem:[%s8160_s10 + $0x188] sm:$0xff]  ;;  %v3096_v20 = vsel %vm2601_vm1, %v5177_v18, 0  ;;  %v6031_v18 = vld [vmem:[%s8162_s12 + $0x23c] ss:$28 sps:$4 sm:$0xff]  }
 0x398   : > { %v5180_v17 = vcombine.high %v2819_v12, %v2819_v12  ;;  %v5179_v19 = vcombine.low %v2819_v12, %v2819_v12  ;;  %v6020_v12 = vld [vmem:[%s8162_s12 + $0x1f8] ss:$28 sps:$4 sm:$0xff]  }
 0x39a   : > { %5183 = vmatprep.subr.msk.bf16.mxu0 %vm2601_vm1, %v5180_v17  ;;  %v3102_v21 = vsel %vm2601_vm1, %v5179_v19, 0  ;;  %v6028_v17 = vld [vmem:[%s8162_s12 + $0x234] ss:$28 sps:$4 sm:$0xff]  }
 0x39b   : > { %3173 = vmatpush1.bf16.msra.mxu0 %v3102_v21  ;;  %v6026_v19 = vld [vmem:[%s8162_s12 + $0x230] ss:$28 sps:$4 sm:$0xff]  }
 0x39c   : > { %4419 = vmatprep.subr.bf16.mxu0 %v5971_v23  ;;  %v6034_v21 = vld [vmem:[%s8162_s12 + $0x26c] ss:$28 sps:$4 sm:$0xff]  }
 0x39d   : > { %v6032_v23 = vld [vmem:[%s8162_s12 + $0x268] ss:$28 sps:$4 sm:$0xff]  }
 0x3a1   : > { %v6217_v24 = vpop.eup %6216 }
 0x3a2   : > { %v2654_v26 = vmul.f32 %v6217_v24, %v2652_v22  ;;  %v5968_v22 = vld [vmem:[%s8162_s12 + $0x4] ss:$28 sps:$4 sm:$0xff]  }
 0x3a3   : > { %v2669_v24 = vld [vmem:[%s8159_s9] sm:$0x3] }
 0x3a4   : > { %2656 = vrot.lane.b32.xlu0 %v2654_v26, %s6297_s25  ;;  %v2674_v25 = vrot.slane %v2669_v24, %v7192_v61  ;;  %v2678_v26 = vrot.slane %v2669_v24, %v7198_v63  ;;  %v6035_v24 = vld [vmem:[%s8162_s12 + $0x270] ss:$28 sps:$4 sm:$0xff]   ;;  %s499_s25 = sand.u32 1, %s6286_s19  }
 0x3a5   : > { %s5445_s16 = smul.u32 28, %s499_s25  ;;  %s4726_s20 = scalar_lea.sflag [#allocation3], %s499_s25 }
 0x3a7   : > { %s8089_s18 = scalar_lea.vmem [#allocation2], %s5445_s16 }
 0x3a8   : > { %s4744_s23 = sshll.u32 %s8089_s18, 4  ;;  %s8107_s23 = int_to_ptr.vmem [resolvable:$true] %s4744_s23 }
 0x3a9   : > { %s6232_s29 = scalar_lea.vmem %s8107_s23, 448  ;;  %p6239_p0 = scmp.lt.s32.totalorder %s8107_s23, %s6237_s27 }
 0x3aa   : > { %p6233_p11 = scmp.ne.s32.totalorder %s8107_s23, %s6232_s29  ;;  %p6240_p1 = scmp.lt.s32.totalorder %s6238_s24, %s6232_s29 }
 0x3ac   : > { %p6234_p12 = pnand %p6233_p11, %p6417_p5  ;;  %p6241_p2 = por %p6240_p1, %p6239_p0 }
 0x3ae   : > { %p6235_p13 = pneg %p6234_p12 }
 0x3b0   : > { %p6242_p3 = pnand %p6241_p2, %p6235_p13 }
 0x416   : > { %v2657_v45 = vpop.permute.xlu0 %2656 }
 0x417   : > { %v2659_v46 = vadd.f32 %v2657_v45, %v7316_v9  ;;  %v5958_v9 = vld [vmem:[%s8160_s10 + $0x164] ss:$16 sps:$4 sm:$0xff]   ;;  %v5983_v45 = vld [vmem:[%s8162_s12 + $0x7c] ss:$28 sps:$4 sm:$0xff]  }
 0x419   : > { %v2660_v48 = vpack.c.bf16 %v2659_v46, %v2659_v46  ;;  %v5978_v46 = vld [vmem:[%s8162_s12 + $0x70] ss:$28 sps:$4 sm:$0xff]  }
 0x41b   : > { %5128 = vmatmul.mubr.msk.bf16.vlgmr.msra.gmra.mrb[8].mxu1 %vm2721_vm3, %v2660_v48  ;;  %v5986_v48 = vld [vmem:[%s8162_s12 + $0xac] ss:$28 sps:$4 sm:$0xff]  }
 0x41c   : > { %3108 = vmatpush1.bf16.msra.mxu1 %v5890_v47  ;;  %v5981_v47 = vld [vmem:[%s8162_s12 + $0x78] ss:$28 sps:$4 sm:$0xff]  }
 0x41d   : > { %3109 = vmatprep.subr.bf16.mxu1 %v5898_v49  ;;  %v5989_v49 = vld [vmem:[%s8162_s12 + $0xb4] ss:$28 sps:$4 sm:$0xff]  }
 0x420   : > { %3110 = vmatpush1.bf16.msra.mxu1 %v5896_v50  ;;  %v5984_v50 = vld [vmem:[%s8162_s12 + $0xa8] ss:$28 sps:$4 sm:$0xff]  }
 0x421   : > { %3111 = vmatprep.subr.bf16.mxu1 %v5904_v51  ;;  %v5987_v51 = vld [vmem:[%s8162_s12 + $0xb0] ss:$28 sps:$4 sm:$0xff]  }
 0x424   : > { %3112 = vmatpush1.bf16.msra.mxu1 %v5902_v52  ;;  %v5992_v52 = vld [vmem:[%s8162_s12 + $0xe4] ss:$28 sps:$4 sm:$0xff]  }
 0x425   : > { %3113 = vmatprep.subr.bf16.mxu1 %v5910_v53  ;;  %v5995_v53 = vld [vmem:[%s8162_s12 + $0xec] ss:$28 sps:$4 sm:$0xff]  }
 0x428   : > { %3114 = vmatpush1.bf16.msra.mxu1 %v5908_v54  ;;  %v5990_v54 = vld [vmem:[%s8162_s12 + $0xe0] ss:$28 sps:$4 sm:$0xff]  }
 0x429   : > { %3115 = vmatprep.subr.bf16.mxu1 %v5916_v55  ;;  %v5993_v55 = vld [vmem:[%s8162_s12 + $0xe8] ss:$28 sps:$4 sm:$0xff]  }
 0x42c   : > { %3116 = vmatpush1.bf16.msra.mxu1 %v5914_v56  ;;  %v5998_v56 = vld [vmem:[%s8162_s12 + $0x11c] ss:$28 sps:$4 sm:$0xff]  }
 0x42d   : > { %3117 = vmatprep.subr.bf16.mxu1 %v5922_v57  ;;  %v6001_v57 = vld [vmem:[%s8162_s12 + $0x124] ss:$28 sps:$4 sm:$0xff]  }
 0x430   : > { %3118 = vmatpush1.bf16.msra.mxu1 %v5920_v58  ;;  %v5996_v58 = vld [vmem:[%s8162_s12 + $0x118] ss:$28 sps:$4 sm:$0xff]  }
 0x431   : > { %3119 = vmatprep.subr.bf16.mxu1 %v5928_v59  ;;  %v5999_v59 = vld [vmem:[%s8162_s12 + $0x120] ss:$28 sps:$4 sm:$0xff]  }
 0x434   : > { %3120 = vmatpush1.bf16.msra.mxu1 %v5926_v62  ;;  %v6004_v62 = vld [vmem:[%s8162_s12 + $0x154] ss:$28 sps:$4 sm:$0xff]  }
 0x435   : > { %3121 = vmatprep.subr.bf16.mxu1 %v5934_v1  ;;  %v6007_v1 = vld [vmem:[%s8162_s12 + $0x15c] ss:$28 sps:$4 sm:$0xff]  }
 0x438   : > { %3122 = vmatpush1.bf16.msra.mxu1 %v5932_v2  ;;  %v6002_v2 = vld [vmem:[%s8162_s12 + $0x150] ss:$28 sps:$4 sm:$0xff]  }
 0x439   : > { %3123 = vmatprep.subr.bf16.mxu1 %v5940_v3  ;;  %v6005_v3 = vld [vmem:[%s8162_s12 + $0x158] ss:$28 sps:$4 sm:$0xff]  }
 0x43c   : > { %3124 = vmatpush1.bf16.msra.mxu1 %v5938_v4  ;;  %v6010_v4 = vld [vmem:[%s8162_s12 + $0x18c] ss:$28 sps:$4 sm:$0xff]  }
 0x43d   : > { %3125 = vmatprep.subr.bf16.mxu1 %v5946_v5  ;;  %v6013_v5 = vld [vmem:[%s8162_s12 + $0x194] ss:$28 sps:$4 sm:$0xff]  }
 0x440   : > { %3126 = vmatpush1.bf16.msra.mxu1 %v5944_v6  ;;  %v6008_v6 = vld [vmem:[%s8162_s12 + $0x188] ss:$28 sps:$4 sm:$0xff]  }
 0x441   : > { %3127 = vmatprep.subr.bf16.mxu1 %v5952_v7  ;;  %v6011_v7 = vld [vmem:[%s8162_s12 + $0x190] ss:$28 sps:$4 sm:$0xff]  }
 0x444   : > { %3128 = vmatpush1.bf16.msra.mxu1 %v5950_v8  ;;  %v6016_v8 = vld [vmem:[%s8162_s12 + $0x1c4] ss:$28 sps:$4 sm:$0xff]  }
 0x445   : > { %3129 = vmatprep.subr.bf16.mxu1 %v5958_v9  ;;  %v6019_v9 = vld [vmem:[%s8162_s12 + $0x1cc] ss:$28 sps:$4 sm:$0xff]  }
 0x448   : > { %3130 = vmatpush1.bf16.msra.mxu1 %v5956_v11  ;;  %v6017_v11 = vld [vmem:[%s8162_s12 + $0x1c8] ss:$28 sps:$4 sm:$0xff]  }
 0x449   : > { %5181 = vmatprep.subr.msk.bf16.mxu1 %vm2601_vm1, %v5178_v16  ;;  %v6023_v16 = vld [vmem:[%s8162_s12 + $0x200] ss:$28 sps:$4 sm:$0xff]  }
 0x44c   : > { %3132 = vmatpush1.bf16.msra.mxu1 %v3096_v20  ;;  %v6029_v20 = vld [vmem:[%s8162_s12 + $0x238] ss:$28 sps:$4 sm:$0xff]  }
 0x44d   : > { %4337 = vmatprep.subr.bf16.mxu1 %v5968_v22  ;;  %v6037_v22 = vld [vmem:[%s8162_s12 + $0x274] ss:$28 sps:$4 sm:$0xff]  }
 0x4ee   : > { %v2759_v27 = vpop.f32.mrb[8].mxu1 }
 0x4ef   : > { %v2760_v28 = vadd.f32 %v2759_v27, %v2674_v25  ;;  %v2761_v29 = vpop.f32.mrb[9].mxu1  ;;  %v6040_v25 = vld [vmem:[%s8162_s12 + $0x2a4] ss:$28 sps:$4 sm:$0xff]  }
 0x4f0   : > { %v2762_v30 = vadd.f32 %v2761_v29, %v2678_v26  ;;  %v2763_v31 = vpop.f32.mrb[10].mxu1  ;;  %v6043_v26 = vld [vmem:[%s8162_s12 + $0x2ac] ss:$28 sps:$4 sm:$0xff]   ;;  %v6038_v27 = vld [vmem:[%s8162_s12 + $0x2a0] ss:$28 sps:$4 sm:$0xff]  }
 0x4f1   : > { %v2766_v32 = vpack.c.bf16 %v2760_v28, %v2760_v28  ;;  %v2764_v34 = vpop.f32.mrb[11].mxu1  ;;  %v6041_v28 = vld [vmem:[%s8162_s12 + $0x2a8] ss:$28 sps:$4 sm:$0xff]   ;;  %v6046_v29 = vld [vmem:[%s8162_s12 + $0x2dc] ss:$28 sps:$4 sm:$0xff]  }
 0x4f2   : > { %v2767_v35 = vpack.c.bf16 %v2762_v30, %v2762_v30  ;;  %v6049_v30 = vld [vmem:[%s8162_s12 + $0x2e4] ss:$28 sps:$4 sm:$0xff]   ;;  %v6044_v31 = vld [vmem:[%s8162_s12 + $0x2d8] ss:$28 sps:$4 sm:$0xff]  }
 0x4f3   : > { %v2768_v39 = vmax.bf16 %v6296_v15, %v2766_v32  ;;  %v6047_v32 = vld [vmem:[%s8162_s12 + $0x2e0] ss:$28 sps:$4 sm:$0xff]   ;;  %v6052_v34 = vld [vmem:[%s8162_s12 + $0x314] ss:$28 sps:$4 sm:$0xff]  }
 0x4f4   : > { %v2769_v36 = vmax.bf16 %v6296_v15, %v2767_v35  ;;  %v6055_v35 = vld [vmem:[%s8162_s12 + $0x31c] ss:$28 sps:$4 sm:$0xff]  }
 0x4f6   : > { %5182 = vmatprep.mubr.msk.bf16.mxu1 %vm2597_vm2, %v2769_v36  ;;  %5184 = vmatprep.mubr.msk.bf16.mxu0 %vm2597_vm2, %v2769_v36  ;;  %v6050_v36 = vld [vmem:[%s8162_s12 + $0x310] ss:$28 sps:$4 sm:$0xff]  }
 0x4f7   : > { %3140 = vmatmul.mubr.bf16.vlgmr.msra.gmra.mrb[12].mxu1 %v2768_v39  ;;  %3181 = vmatmul.mubr.bf16.vlgmr.msra.gmra.mrb[8].mxu0 %v2768_v39  ;;  %v6061_v39 = vld [vmem:[%s8162_s12 + $0x354] ss:$28 sps:$4 sm:$0xff]  }
 0x4f8   : > { %4338 = vmatpush1.bf16.msra.mxu1 %v5966_v37  ;;  %4420 = vmatpush1.bf16.msra.mxu0 %v5969_v38  ;;  %v6053_v37 = vld [vmem:[%s8162_s12 + $0x318] ss:$28 sps:$4 sm:$0xff]   ;;  %v6058_v38 = vld [vmem:[%s8162_s12 + $0x34c] ss:$28 sps:$4 sm:$0xff]  }
 0x4f9   : > { %4339 = vmatprep.subr.bf16.mxu1 %v5974_v40  ;;  %4421 = vmatprep.subr.bf16.mxu0 %v5977_v41  ;;  %v6056_v40 = vld [vmem:[%s8162_s12 + $0x348] ss:$28 sps:$4 sm:$0xff]   ;;  %v6059_v41 = vld [vmem:[%s8162_s12 + $0x350] ss:$28 sps:$4 sm:$0xff]  }
 0x4fc   : > { %4340 = vmatpush1.bf16.msra.mxu1 %v5972_v42  ;;  %4422 = vmatpush1.bf16.msra.mxu0 %v5975_v43  ;;  %v6064_v42 = vld [vmem:[%s8162_s12 + $0x384] ss:$28 sps:$4 sm:$0xff]   ;;  %v6067_v43 = vld [vmem:[%s8162_s12 + $0x38c] ss:$28 sps:$4 sm:$0xff]  }
 0x4fd   : > { %4341 = vmatprep.subr.bf16.mxu1 %v5980_v44  ;;  %4423 = vmatprep.subr.bf16.mxu0 %v5983_v45  ;;  %v7692_v44 = vld [vmem:[%s8161_s11] sm:$0xf] }
 0x4fe   : > { %v2825_v45 = vrot.slane %v7692_v44, %v7192_v61 }
 0x500   : > { %4342 = vmatpush1.bf16.msra.mxu1 %v5978_v46  ;;  %4424 = vmatpush1.bf16.msra.mxu0 %v5981_v47  ;;  %v2829_v46 = vrot.slane %v7692_v44, %v7198_v63  ;;  %v2837_v47 = vrot.slane %v7692_v44, %v7201_v0 }
 0x501   : > { %4343 = vmatprep.subr.bf16.mxu1 %v5986_v48  ;;  %4425 = vmatprep.subr.bf16.mxu0 %v5989_v49 }
 0x504   : > { %4344 = vmatpush1.bf16.msra.mxu1 %v5984_v50  ;;  %4426 = vmatpush1.bf16.msra.mxu0 %v5987_v51 }
 0x505   : > { %4345 = vmatprep.subr.bf16.mxu1 %v5992_v52  ;;  %4427 = vmatprep.subr.bf16.mxu0 %v5995_v53 }
 0x508   : > { %4346 = vmatpush1.bf16.msra.mxu1 %v5990_v54  ;;  %4428 = vmatpush1.bf16.msra.mxu0 %v5993_v55 }
 0x509   : > { %4347 = vmatprep.subr.bf16.mxu1 %v5998_v56  ;;  %4429 = vmatprep.subr.bf16.mxu0 %v6001_v57 }
 0x50c   : > { %4348 = vmatpush1.bf16.msra.mxu1 %v5996_v58  ;;  %4430 = vmatpush1.bf16.msra.mxu0 %v5999_v59 }
 0x50d   : > { %4349 = vmatprep.subr.bf16.mxu1 %v6004_v62  ;;  %4431 = vmatprep.subr.bf16.mxu0 %v6007_v1 }
 0x510   : > { %4350 = vmatpush1.bf16.msra.mxu1 %v6002_v2  ;;  %4432 = vmatpush1.bf16.msra.mxu0 %v6005_v3  ;;  %v6062_v3 = vld [vmem:[%s8162_s12 + $0x380] ss:$28 sps:$4 sm:$0xff]  }
 0x511   : > { %4351 = vmatprep.subr.bf16.mxu1 %v6010_v4  ;;  %4433 = vmatprep.subr.bf16.mxu0 %v6013_v5  ;;  %v6065_v4 = vld [vmem:[%s8162_s12 + $0x388] ss:$28 sps:$4 sm:$0xff]  }
 0x514   : > { %4352 = vmatpush1.bf16.msra.mxu1 %v6008_v6  ;;  %4434 = vmatpush1.bf16.msra.mxu0 %v6011_v7  ;;  %v6070_v6 = vld [vmem:[%s8162_s12 + $0x3bc] ss:$28 sps:$4 sm:$0xff]   ;;  %v6073_v7 = vld [vmem:[%s8162_s12 + $0x3c4] ss:$28 sps:$4 sm:$0xff]  }
 0x515   : > { %4353 = vmatprep.subr.bf16.mxu1 %v6016_v8  ;;  %4435 = vmatprep.subr.bf16.mxu0 %v6019_v9  ;;  %v6068_v9 = vld [vmem:[%s8162_s12 + $0x3b8] ss:$28 sps:$4 sm:$0xff]  }
 0x518   : > { %4354 = vmatpush1.bf16.msra.mxu1 %v6014_v10  ;;  %4436 = vmatpush1.bf16.msra.mxu0 %v6017_v11  ;;  %v6071_v10 = vld [vmem:[%s8162_s12 + $0x3c0] ss:$28 sps:$4 sm:$0xff]   ;;  %v6076_v11 = vld [vmem:[%s8162_s12 + $0x3f4] ss:$28 sps:$4 sm:$0xff]  }
 0x519   : > { %4355 = vmatprep.subr.bf16.mxu1 %v6022_v13  ;;  %4437 = vmatprep.subr.bf16.mxu0 %v6025_v14  ;;  %v6079_v13 = vld [vmem:[%s8162_s12 + $0x3fc] ss:$28 sps:$4 sm:$0xff]   ;;  %v6074_v14 = vld [vmem:[%s8162_s12 + $0x3f0] ss:$28 sps:$4 sm:$0xff]  }
 0x51c   : > { %4356 = vmatpush1.bf16.msra.mxu1 %v6020_v12  ;;  %4438 = vmatpush1.bf16.msra.mxu0 %v6023_v16  ;;  %v6077_v12 = vld [vmem:[%s8162_s12 + $0x3f8] ss:$28 sps:$4 sm:$0xff]   ;;  %v6082_v16 = vld [vmem:[%s8162_s12 + $0x42c] ss:$28 sps:$4 sm:$0xff]  }
 0x51d   : > { %4357 = vmatprep.subr.bf16.mxu1 %v6028_v17  ;;  %4439 = vmatprep.subr.bf16.mxu0 %v6031_v18  ;;  %v6085_v17 = vld [vmem:[%s8162_s12 + $0x434] ss:$28 sps:$4 sm:$0xff]   ;;  %v6080_v18 = vld [vmem:[%s8162_s12 + $0x428] ss:$28 sps:$4 sm:$0xff]  }
 0x520   : > { %4358 = vmatpush1.bf16.msra.mxu1 %v6026_v19  ;;  %4440 = vmatpush1.bf16.msra.mxu0 %v6029_v20  ;;  %v6083_v19 = vld [vmem:[%s8162_s12 + $0x430] ss:$28 sps:$4 sm:$0xff]   ;;  %v6088_v20 = vld [vmem:[%s8162_s12 + $0x464] ss:$28 sps:$4 sm:$0xff]  }
 0x521   : > { %4359 = vmatprep.subr.bf16.mxu1 %v6034_v21  ;;  %4441 = vmatprep.subr.bf16.mxu0 %v6037_v22  ;;  %v6091_v21 = vld [vmem:[%s8162_s12 + $0x46c] ss:$28 sps:$4 sm:$0xff]   ;;  %v6086_v22 = vld [vmem:[%s8162_s12 + $0x460] ss:$28 sps:$4 sm:$0xff]  }
 0x524   : > { %4360 = vmatpush1.bf16.msra.mxu1 %v6032_v23  ;;  %4442 = vmatpush1.bf16.msra.mxu0 %v6035_v24  ;;  %v6089_v23 = vld [vmem:[%s8162_s12 + $0x468] ss:$28 sps:$4 sm:$0xff]   ;;  %v6094_v24 = vld [vmem:[%s8162_s12 + $0x49c] ss:$28 sps:$4 sm:$0xff]  }
 0x525   : > { %4361 = vmatprep.subr.bf16.mxu1 %v6040_v25  ;;  %4443 = vmatprep.subr.bf16.mxu0 %v6043_v26  ;;  %v6097_v25 = vld [vmem:[%s8162_s12 + $0x4a4] ss:$28 sps:$4 sm:$0xff]   ;;  %v6092_v26 = vld [vmem:[%s8162_s12 + $0x498] ss:$28 sps:$4 sm:$0xff]  }
 0x528   : > { %4362 = vmatpush1.bf16.msra.mxu1 %v6038_v27  ;;  %4444 = vmatpush1.bf16.msra.mxu0 %v6041_v28  ;;  %v6095_v27 = vld [vmem:[%s8162_s12 + $0x4a0] ss:$28 sps:$4 sm:$0xff]   ;;  %v6100_v28 = vld [vmem:[%s8162_s12 + $0x4d4] ss:$28 sps:$4 sm:$0xff]  }
 0x529   : > { %4363 = vmatprep.subr.bf16.mxu1 %v6046_v29  ;;  %4445 = vmatprep.subr.bf16.mxu0 %v6049_v30  ;;  %v6103_v29 = vld [vmem:[%s8162_s12 + $0x4dc] ss:$28 sps:$4 sm:$0xff]   ;;  %v6098_v30 = vld [vmem:[%s8162_s12 + $0x4d0] ss:$28 sps:$4 sm:$0xff]  }
 0x52c   : > { %4364 = vmatpush1.bf16.msra.mxu1 %v6044_v31  ;;  %4446 = vmatpush1.bf16.msra.mxu0 %v6047_v32  ;;  %v6101_v31 = vld [vmem:[%s8162_s12 + $0x4d8] ss:$28 sps:$4 sm:$0xff]   ;;  %v2833_v32 = vrot.slane %v7692_v44, %v7244_v33 }
 0x52d   : > { %4365 = vmatprep.subr.bf16.mxu1 %v6052_v34  ;;  %4447 = vmatprep.subr.bf16.mxu0 %v6055_v35  ;;  %v6106_v34 = vld [vmem:[%s8162_s12 + $0x50c] ss:$28 sps:$4 sm:$0xff]   ;;  %v6109_v35 = vld [vmem:[%s8162_s12 + $0x514] ss:$28 sps:$4 sm:$0xff]  }
 0x52e   : > { %v6118_v44 = vld [vmem:[%s8162_s12 + $0x14] ss:$28 sps:$4 sm:$0xff]  }
 0x530   : > { %4366 = vmatpush1.bf16.msra.mxu1 %v6050_v36  ;;  %4448 = vmatpush1.bf16.msra.mxu0 %v6053_v37  ;;  %v6104_v36 = vld [vmem:[%s8162_s12 + $0x508] ss:$28 sps:$4 sm:$0xff]   ;;  %v6107_v37 = vld [vmem:[%s8162_s12 + $0x510] ss:$28 sps:$4 sm:$0xff]  }
 0x531   : > { %4367 = vmatprep.subr.bf16.mxu1 %v6058_v38  ;;  %4449 = vmatprep.subr.bf16.mxu0 %v6061_v39  ;;  %v6112_v39 = vld [vmem:[%s8162_s12 + $0x544] ss:$28 sps:$4 sm:$0xff]  }
 0x534   : > { %4368 = vmatpush1.bf16.msra.mxu1 %v6056_v40  ;;  %4450 = vmatpush1.bf16.msra.mxu0 %v6059_v41  ;;  %v6115_v40 = vld [vmem:[%s8162_s12 + $0x54c] ss:$28 sps:$4 sm:$0xff]   ;;  %v6110_v41 = vld [vmem:[%s8162_s12 + $0x540] ss:$28 sps:$4 sm:$0xff]  }
 0x535   : > { %4378 = vmatprep.subr.bf16.mxu1 %v6064_v42  ;;  %4460 = vmatprep.subr.bf16.mxu0 %v6067_v43  ;;  %v6113_v42 = vld [vmem:[%s8162_s12 + $0x548] ss:$28 sps:$4 sm:$0xff]  }
 0x5ca   : > { %v3141_v48 = vpop.f32.mrb[12].mxu1  ;;  %v7700_v49 = vpop.f32.mrb[8].mxu0 }
 0x5cb   : > { %v3142_v50 = vadd.f32 %v3141_v48, %v2825_v45  ;;  %v3143_v51 = vpop.f32.mrb[13].mxu1  ;;  %v3184_v52 = vpop.f32.mrb[9].mxu0  ;;  %v3183_v38 = vadd.f32 %v7700_v49, %v2833_v32  ;;  %v6119_v45 = vld [vmem:[%s8162_s12 + $0x1d8] ss:$28 sps:$4 sm:$0xff]   ;;  %v6123_v49 = vld [vmem:[%s8162_s12 + $0x4c] ss:$28 sps:$4 sm:$0xff]  }
 0x5cc   : > { %v3144_v53 = vadd.f32 %v3143_v51, %v2829_v46  ;;  %v3185_v54 = vadd.f32 %v3184_v52, %v2837_v47  ;;  %v3145_v55 = vpop.f32.mrb[14].mxu1  ;;  %v3186_v56 = vpop.f32.mrb[10].mxu0  ;;  %v6116_v46 = vld [vmem:[%s8162_s12 + $0x10] ss:$28 sps:$4 sm:$0xff]   ;;  %v6120_v48 = vld [vmem:[%s8162_s12 + $0x18] ss:$28 sps:$4 sm:$0xff]  }
 0x5cd   : > { %v3189_v57 = vpack.c.bf16 %v3142_v50, %v3142_v50  ;;  %v3146_v58 = vpop.f32.mrb[15].mxu1  ;;  %v3187_v59 = vpop.f32.mrb[11].mxu0  ;;  %v3191_v43 = vpack.c.bf16 %v3183_v38, %v3183_v38  ;;  %v6124_v50 = vld [vmem:[%s8162_s12 + $0x210] ss:$28 sps:$4 sm:$0xff]   ;;  %v6121_v51 = vld [vmem:[%s8162_s12 + $0x48] ss:$28 sps:$4 sm:$0xff]  }
 0x5ce   : > { %v3190_v62 = vpack.c.bf16 %v3144_v53, %v3144_v53  ;;  %v3192_v1 = vpack.c.bf16 %v3185_v54, %v3185_v54  ;;  %v6125_v52 = vld [vmem:[%s8162_s12 + $0x50] ss:$28 sps:$4 sm:$0xff]   ;;  %v6128_v53 = vld [vmem:[%s8162_s12 + $0x84] ss:$28 sps:$4 sm:$0xff]   ;;  %v6131_v59 = vld [vmem:[%s8162_s12 + $0xb8] ss:$28 sps:$4 sm:$0xff]  }
 0x5cf   : > { %v7712_v5 = vmax.bf16 %v6296_v15, %v3189_v57  ;;  %v7834_v47 = vmax.bf16 %v6296_v15, %v3191_v43  ;;  %v6129_v54 = vld [vmem:[%s8162_s12 + $0x248] ss:$28 sps:$4 sm:$0xff]   ;;  %v6126_v55 = vld [vmem:[%s8162_s12 + $0x80] ss:$28 sps:$4 sm:$0xff]   ;;  %v6174_v32 = vld [vmem:[%s8162_s12 + $0x2b4] ss:$28 sps:$4 sm:$0xff]  }
 0x5d0   : > { %v7703_v2 = vmax.bf16 %v6296_v15, %v3190_v62  ;;  %v7723_v8 = vmax.bf16 %v6296_v15, %v3192_v1  ;;  %v6130_v56 = vld [vmem:[%s8162_s12 + $0x88] ss:$28 sps:$4 sm:$0xff]   ;;  %v6133_v57 = vld [vmem:[%s8162_s12 + $0xbc] ss:$28 sps:$4 sm:$0xff]   ;;  %v6138_v1 = vld [vmem:[%s8162_s12 + $0xf4] ss:$28 sps:$4 sm:$0xff]  }
 0x5d1   : > { %v6134_v58 = vld [vmem:[%s8162_s12 + $0x280] ss:$28 sps:$4 sm:$0xff]   ;;  %v6179_v38 = vld [vmem:[%s8162_s12 + $0x4b0] ss:$28 sps:$4 sm:$0xff]   ;;  %v6184_v43 = vld [vmem:[%s8162_s12 + $0x358] ss:$28 sps:$4 sm:$0xff]  }
 0x5d2   : > { %4369 = vmatprep.mubr.bf16.mxu1 %v7703_v2  ;;  %4451 = vmatprep.mubr.bf16.mxu0 %v7703_v2  ;;  %v6135_v62 = vld [vmem:[%s8162_s12 + $0xc0] ss:$28 sps:$4 sm:$0xff]  }
 0x5d3   : > { %4370 = vmatmul.mubr.bf16.vlgmr.msra.gmra.mrb[16].mxu1 %v7712_v5  ;;  %4452 = vmatmul.mubr.bf16.vlgmr.msra.gmra.mrb[12].mxu0 %v7712_v5 }
 0x5d4   : > { %4379 = vmatpush1.bf16.msra.mxu1 %v6062_v3  ;;  %4461 = vmatpush1.bf16.msra.mxu0 %v6065_v4  ;;  %v6136_v3 = vld [vmem:[%s8162_s12 + $0xf0] ss:$28 sps:$4 sm:$0xff]   ;;  %v6140_v4 = vld [vmem:[%s8162_s12 + $0xf8] ss:$28 sps:$4 sm:$0xff]  }
 0x5d5   : > { %5360 = vmatprep.mubr.msk.bf16.mxu1 %vm1749_vm0, %v7723_v8  ;;  %5361 = vmatprep.mubr.msk.bf16.mxu0 %vm1749_vm0, %v7723_v8 }
 0x5d6   : > { %4380 = vmatprep.subr.bf16.mxu1 %v6070_v6  ;;  %4462 = vmatprep.subr.bf16.mxu0 %v6073_v7  ;;  %v6143_v6 = vld [vmem:[%s8162_s12 + $0x12c] ss:$28 sps:$4 sm:$0xff]  }
 0x5d7   : > { %v6144_v7 = vld [vmem:[%s8162_s12 + $0x2f0] ss:$28 sps:$4 sm:$0xff]  }
 0x5d8   : > { %4381 = vmatpush1.bf16.msra.mxu1 %v6068_v9  ;;  %4463 = vmatpush1.bf16.msra.mxu0 %v6071_v10  ;;  %v6141_v9 = vld [vmem:[%s8162_s12 + $0x128] ss:$28 sps:$4 sm:$0xff]   ;;  %v6145_v10 = vld [vmem:[%s8162_s12 + $0x130] ss:$28 sps:$4 sm:$0xff]  }
 0x5d9   : > { %4382 = vmatprep.subr.bf16.mxu1 %v6076_v11  ;;  %4464 = vmatprep.subr.bf16.mxu0 %v6079_v13  ;;  %v6148_v11 = vld [vmem:[%s8162_s12 + $0x164] ss:$28 sps:$4 sm:$0xff]  }
 0x5da   : > { %v6149_v13 = vld [vmem:[%s8162_s12 + $0x328] ss:$28 sps:$4 sm:$0xff]  }
 0x5dc   : > { %4383 = vmatpush1.bf16.msra.mxu1 %v6074_v14  ;;  %4465 = vmatpush1.bf16.msra.mxu0 %v6077_v12  ;;  %v6146_v14 = vld [vmem:[%s8162_s12 + $0x160] ss:$28 sps:$4 sm:$0xff]   ;;  %v6150_v12 = vld [vmem:[%s8162_s12 + $0x168] ss:$28 sps:$4 sm:$0xff]  }
 0x5dd   : > { %4384 = vmatprep.subr.bf16.mxu1 %v6082_v16  ;;  %4466 = vmatprep.subr.bf16.mxu0 %v6085_v17  ;;  %v6153_v16 = vld [vmem:[%s8162_s12 + $0x19c] ss:$28 sps:$4 sm:$0xff]  }
 0x5de   : > { %v6154_v17 = vld [vmem:[%s8162_s12 + $0x360] ss:$28 sps:$4 sm:$0xff]  }
 0x5e0   : > { %4385 = vmatpush1.bf16.msra.mxu1 %v6080_v18  ;;  %4467 = vmatpush1.bf16.msra.mxu0 %v6083_v19  ;;  %v6151_v18 = vld [vmem:[%s8162_s12 + $0x198] ss:$28 sps:$4 sm:$0xff]   ;;  %v6155_v19 = vld [vmem:[%s8162_s12 + $0x1a0] ss:$28 sps:$4 sm:$0xff]  }
 0x5e1   : > { %4386 = vmatprep.subr.bf16.mxu1 %v6088_v20  ;;  %4468 = vmatprep.subr.bf16.mxu0 %v6091_v21  ;;  %v6158_v20 = vld [vmem:[%s8162_s12 + $0x1d4] ss:$28 sps:$4 sm:$0xff]  }
 0x5e2   : > { %v6156_v21 = vld [vmem:[%s8162_s12 + $0x1d0] ss:$28 sps:$4 sm:$0xff]  }
 0x5e4   : > { %4387 = vmatpush1.bf16.msra.mxu1 %v6086_v22  ;;  %4469 = vmatpush1.bf16.msra.mxu0 %v6089_v23  ;;  %v6159_v22 = vld [vmem:[%s8162_s12 + $0x398] ss:$28 sps:$4 sm:$0xff]   ;;  %v6162_v23 = vld [vmem:[%s8162_s12 + $0x20c] ss:$28 sps:$4 sm:$0xff]  }
 0x5e5   : > { %4388 = vmatprep.subr.bf16.mxu1 %v6094_v24  ;;  %4470 = vmatprep.subr.bf16.mxu0 %v6097_v25  ;;  %v6160_v24 = vld [vmem:[%s8162_s12 + $0x208] ss:$28 sps:$4 sm:$0xff]   ;;  %v6163_v25 = vld [vmem:[%s8162_s12 + $0x3d0] ss:$28 sps:$4 sm:$0xff]  }
 0x5e8   : > { %4389 = vmatpush1.bf16.msra.mxu1 %v6092_v26  ;;  %4471 = vmatpush1.bf16.msra.mxu0 %v6095_v27  ;;  %v6166_v26 = vld [vmem:[%s8162_s12 + $0x244] ss:$28 sps:$4 sm:$0xff]  }
 0x5e9   : > { %4390 = vmatprep.subr.bf16.mxu1 %v6100_v28  ;;  %4472 = vmatprep.subr.bf16.mxu0 %v6103_v29  ;;  %v6164_v27 = vld [vmem:[%s8162_s12 + $0x240] ss:$28 sps:$4 sm:$0xff]   ;;  %v6167_v28 = vld [vmem:[%s8162_s12 + $0x408] ss:$28 sps:$4 sm:$0xff]  }
 0x5ea   : > { %v6170_v29 = vld [vmem:[%s8162_s12 + $0x27c] ss:$28 sps:$4 sm:$0xff]  }
 0x5ec   : > { %4391 = vmatpush1.bf16.msra.mxu1 %v6098_v30  ;;  %4473 = vmatpush1.bf16.msra.mxu0 %v6101_v31  ;;  %v6168_v30 = vld [vmem:[%s8162_s12 + $0x278] ss:$28 sps:$4 sm:$0xff]   ;;  %v6171_v31 = vld [vmem:[%s8162_s12 + $0x440] ss:$28 sps:$4 sm:$0xff]  }
 0x5ed   : > { %4392 = vmatprep.subr.bf16.mxu1 %v6106_v34  ;;  %4474 = vmatprep.subr.bf16.mxu0 %v6109_v35  ;;  %v6172_v34 = vld [vmem:[%s8162_s12 + $0x2b0] ss:$28 sps:$4 sm:$0xff]   ;;  %v6175_v35 = vld [vmem:[%s8162_s12 + $0x478] ss:$28 sps:$4 sm:$0xff]  }
 0x5f0   : > { %4393 = vmatpush1.bf16.msra.mxu1 %v6104_v36  ;;  %4475 = vmatpush1.bf16.msra.mxu0 %v6107_v37  ;;  %v6178_v36 = vld [vmem:[%s8162_s12 + $0x2ec] ss:$28 sps:$4 sm:$0xff]  }
 0x5f1   : > { %4394 = vmatprep.subr.bf16.mxu1 %v6112_v39  ;;  %4476 = vmatprep.subr.bf16.mxu0 %v6115_v40  ;;  %v6176_v37 = vld [vmem:[%s8162_s12 + $0x2e8] ss:$28 sps:$4 sm:$0xff]   ;;  %v6180_v40 = vld [vmem:[%s8162_s12 + $0x320] ss:$28 sps:$4 sm:$0xff]  }
 0x5f2   : > { %v6182_v39 = vld [vmem:[%s8162_s12 + $0x324] ss:$28 sps:$4 sm:$0xff]  }
 0x5f4   : > { %4395 = vmatpush1.bf16.msra.mxu1 %v6110_v41  ;;  %4477 = vmatpush1.bf16.msra.mxu0 %v6113_v42  ;;  %v6183_v41 = vld [vmem:[%s8162_s12 + $0x4e8] ss:$28 sps:$4 sm:$0xff]   ;;  %v6186_v42 = vld [vmem:[%s8162_s12 + $0x35c] ss:$28 sps:$4 sm:$0xff]  }
 0x5f5   : > { %4501 = vmatprep.subr.bf16.mxu1 %v6118_v44  ;;  %5371 = vmatprep.subr.bf16.mxu0 %v6119_v45  ;;  %v6187_v44 = vld [vmem:[%s8162_s12 + $0x520] ss:$28 sps:$4 sm:$0xff]   ;;  %v6190_v45 = vld [vmem:[%s8162_s12 + $0x394] ss:$28 sps:$4 sm:$0xff]  }
 0x5f7   : > { %4411 = vmatmul.mubr.bf16.vlgmr.msra.gmra.mrb[16].mxu1 %v7834_v47  ;;  %4493 = vmatmul.mubr.bf16.vlgmr.msra.gmra.mrb[12].mxu0 %v7834_v47 }
 0x5f8   : > { %4502 = vmatpush1.bf16.msra.mxu1 %v6116_v46  ;;  %4533 = vmatprep.mubr.bf16.mxu1 %v7703_v2  ;;  %v6188_v46 = vld [vmem:[%s8162_s12 + $0x390] ss:$28 sps:$4 sm:$0xff]  }
 0x5f9   : > { %5372 = vmatpush3.bf16.msra.mxu0 %v6120_v48  ;;  %4615 = vmatprep.mubr.bf16.mxu0 %v7703_v2  ;;  %v6139_v2 = vld [vmem:[%s8162_s12 + $0x2b8] ss:$28 sps:$4 sm:$0xff]  }
 0x5fa   : > { %4503 = vmatprep.subr.bf16.mxu1 %v6123_v49  ;;  %5373 = vmatprep.subr.bf16.mxu0 %v6124_v50  ;;  %v6191_v48 = vld [vmem:[%s8162_s12 + $0x558] ss:$28 sps:$4 sm:$0xff]   ;;  %v6194_v49 = vld [vmem:[%s8162_s12 + $0x3cc] ss:$28 sps:$4 sm:$0xff]  }
 0x5fb   : > { %v6192_v50 = vld [vmem:[%s8162_s12 + $0x3c8] ss:$28 sps:$4 sm:$0xff]  }
 0x5fc   : > { %4504 = vmatpush1.bf16.msra.mxu1 %v6121_v51  ;;  %v6197_v51 = vld [vmem:[%s8162_s12 + $0x404] ss:$28 sps:$4 sm:$0xff]  }
 0x5fd   : > { %5374 = vmatpush3.bf16.msra.mxu0 %v6125_v52  ;;  %4505 = vmatprep.subr.bf16.mxu1 %v6128_v53  ;;  %v6203_v52 = vld [vmem:[%s8162_s12 + $0x474] ss:$28 sps:$4 sm:$0xff]  }
 0x5fe   : > { %5375 = vmatprep.subr.bf16.mxu0 %v6129_v54  ;;  %v6201_v53 = vld [vmem:[%s8162_s12 + $0x470] ss:$28 sps:$4 sm:$0xff]  }
 0x5ff   : > { %v6206_v54 = vld [vmem:[%s8162_s12 + $0x4ac] ss:$28 sps:$4 sm:$0xff]  }
 0x600   : > { %4506 = vmatpush1.bf16.msra.mxu1 %v6126_v55  ;;  %v6204_v55 = vld [vmem:[%s8162_s12 + $0x4a8] ss:$28 sps:$4 sm:$0xff]  }
 0x601   : > { %5376 = vmatpush3.bf16.msra.mxu0 %v6130_v56  ;;  %4507 = vmatprep.subr.bf16.mxu1 %v6133_v57  ;;  %v6209_v56 = vld [vmem:[%s8162_s12 + $0x4e4] ss:$28 sps:$4 sm:$0xff]  }
 0x602   : > { %5377 = vmatprep.subr.bf16.mxu0 %v6134_v58  ;;  %v6207_v57 = vld [vmem:[%s8162_s12 + $0x4e0] ss:$28 sps:$4 sm:$0xff]  }
 0x603   : > { %v6212_v58 = vld [vmem:[%s8162_s12 + $0x51c] ss:$28 sps:$4 sm:$0xff]  }
 0x604   : > { %4508 = vmatpush1.bf16.msra.mxu1 %v6131_v59  ;;  %v6210_v59 = vld [vmem:[%s8162_s12 + $0x518] ss:$28 sps:$4 sm:$0xff]  }
 0x605   : > { %5378 = vmatpush3.bf16.msra.mxu0 %v6135_v62  ;;  %4509 = vmatprep.subr.bf16.mxu1 %v6138_v1  ;;  %v6215_v62 = vld [vmem:[%s8162_s12 + $0x554] ss:$28 sps:$4 sm:$0xff]  }
 0x606   : > { %5379 = vmatprep.subr.bf16.mxu0 %v6139_v2  ;;  %v6213_v1 = vld [vmem:[%s8162_s12 + $0x550] ss:$28 sps:$4 sm:$0xff]   ;;  %v8076_v2 = vld [vmem:[%s8163_s13] sm:$0x7f] }
 0x608   : > { %4510 = vmatpush1.bf16.msra.mxu1 %v6136_v3  ;;  %v3402_v3 = vrot.slane %v8076_v2, %v7192_v61 }
 0x609   : > { %5380 = vmatpush3.bf16.msra.mxu0 %v6140_v4  ;;  %4511 = vmatprep.subr.bf16.mxu1 %v6143_v6  ;;  %v3410_v4 = vrot.slane %v8076_v2, %v7244_v33  ;;  %v3406_v6 = vrot.slane %v8076_v2, %v7198_v63 }
 0x60a   : > { %5381 = vmatprep.subr.bf16.mxu0 %v6144_v7  ;;  %v3414_v7 = vrot.slane %v8076_v2, %v7201_v0 }
 0x60c   : > { %4512 = vmatpush1.bf16.msra.mxu1 %v6141_v9 }
 0x60d   : > { %5382 = vmatpush3.bf16.msra.mxu0 %v6145_v10  ;;  %4513 = vmatprep.subr.bf16.mxu1 %v6148_v11 }
 0x60e   : > { %5383 = vmatprep.subr.bf16.mxu0 %v6149_v13 }
 0x610   : > { %4514 = vmatpush1.bf16.msra.mxu1 %v6146_v14 }
 0x611   : > { %5384 = vmatpush3.bf16.msra.mxu0 %v6150_v12  ;;  %4515 = vmatprep.subr.bf16.mxu1 %v6153_v16 }
 0x612   : > { %5385 = vmatprep.subr.bf16.mxu0 %v6154_v17 }
 0x614   : > { %4516 = vmatpush1.bf16.msra.mxu1 %v6151_v18 }
 0x615   : > { %5386 = vmatpush3.bf16.msra.mxu0 %v6155_v19  ;;  %4517 = vmatprep.subr.bf16.mxu1 %v6158_v20 }
 0x616   : > { %4623 = vmatprep.subr.bf16.mxu0 %v6296_v15 }
 0x618   : > { %4616 = vmatmul.mubr.bf16.vlgmr.msra.gmra.mrb[16].mxu0 %v7712_v5  ;;  %4518 = vmatpush1.bf16.msra.mxu1 %v6156_v21 }
 0x619   : > { %4624 = vmatpush1.bf16.msra.mxu0 %v6159_v22  ;;  %5363 = vmatprep.mubr.msk.bf16.mxu0 %vm1749_vm0, %v7723_v8 }
 0x61a   : > { %4519 = vmatprep.subr.bf16.mxu1 %v6162_v23  ;;  %4625 = vmatprep.subr.bf16.mxu0 %v6296_v15 }
 0x61c   : > { %4520 = vmatpush1.bf16.msra.mxu1 %v6160_v24 }
 0x61d   : > { %4626 = vmatpush1.bf16.msra.mxu0 %v6163_v25  ;;  %4521 = vmatprep.subr.bf16.mxu1 %v6166_v26 }
 0x61e   : > { %4627 = vmatprep.subr.bf16.mxu0 %v6296_v15 }
 0x620   : > { %4522 = vmatpush1.bf16.msra.mxu1 %v6164_v27 }
 0x621   : > { %4628 = vmatpush1.bf16.msra.mxu0 %v6167_v28  ;;  %4523 = vmatprep.subr.bf16.mxu1 %v6170_v29 }
 0x622   : > { %4629 = vmatprep.subr.bf16.mxu0 %v6296_v15 }
 0x624   : > { %4524 = vmatpush1.bf16.msra.mxu1 %v6168_v30 }
 0x625   : > { %4630 = vmatpush1.bf16.msra.mxu0 %v6171_v31  ;;  %4525 = vmatprep.subr.bf16.mxu1 %v6174_v32 }
 0x626   : > { %4631 = vmatprep.subr.bf16.mxu0 %v6296_v15 }
 0x628   : > { %4526 = vmatpush1.bf16.msra.mxu1 %v6172_v34 }
 0x629   : > { %4632 = vmatpush1.bf16.msra.mxu0 %v6175_v35  ;;  %4527 = vmatprep.subr.bf16.mxu1 %v6178_v36 }
 0x62a   : > { %4633 = vmatprep.subr.bf16.mxu0 %v6296_v15 }
 0x62c   : > { %4528 = vmatpush1.bf16.msra.mxu1 %v6176_v37 }
 0x62d   : > { %4634 = vmatpush1.bf16.msra.mxu0 %v6179_v38  ;;  %4529 = vmatprep.subr.bf16.mxu1 %v6182_v39 }
 0x62e   : > { %4635 = vmatprep.subr.bf16.mxu0 %v6296_v15 }
 0x630   : > { %4530 = vmatpush1.bf16.msra.mxu1 %v6180_v40 }
 0x631   : > { %4636 = vmatpush1.bf16.msra.mxu0 %v6183_v41  ;;  %4531 = vmatprep.subr.bf16.mxu1 %v6186_v42 }
 0x632   : > { %4637 = vmatprep.subr.bf16.mxu0 %v6296_v15 }
 0x634   : > { %4532 = vmatpush1.bf16.msra.mxu1 %v6184_v43 }
 0x635   : > { %4638 = vmatpush1.bf16.msra.mxu0 %v6187_v44  ;;  %4542 = vmatprep.subr.bf16.mxu1 %v6190_v45  ;;  %v3425_v45 = vsub.s32 6, %v7189_v60 }
 0x636   : > { %4639 = vmatprep.subr.bf16.mxu0 %v6296_v15  ;;  %v6195_v15 = vld [vmem:[%s8162_s12 + $0x400] ss:$28 sps:$4 sm:$0xff]  }
 0x637   : > { %4534 = vmatmul.mubr.bf16.vlgmr.msra.gmra.mrb[20].mxu1 %v7712_v5  ;;  %v6200_v5 = vld [vmem:[%s8162_s12 + $0x43c] ss:$28 sps:$4 sm:$0xff]  }
 0x638   : > { %4543 = vmatpush1.bf16.msra.mxu1 %v6188_v46  ;;  %5362 = vmatprep.mubr.msk.bf16.mxu1 %vm1749_vm0, %v7723_v8  ;;  %v6198_v8 = vld [vmem:[%s8162_s12 + $0x438] ss:$28 sps:$4 sm:$0xff]   ;;  %v3426_v46 = vrot.slane %v8076_v2, %v3425_v45 }
 0x639   : > { %4640 = vmatpush1.bf16.msra.mxu0 %v6191_v48  ;;  %4544 = vmatprep.subr.bf16.mxu1 %v6194_v49 }
 0x63c   : > { %4656 = vmatmul.mubr.bf16.vlgmr.msra.gmra.mrb[20].mxu0 %v7834_v47  ;;  %4545 = vmatpush1.bf16.msra.mxu1 %v6192_v50 }
 0x63d   : > { %4546 = vmatprep.subr.bf16.mxu1 %v6197_v51 }
 0x640   : > { %4547 = vmatpush1.bf16.msra.mxu1 %v6195_v15 }
 0x641   : > { %4548 = vmatprep.subr.bf16.mxu1 %v6200_v5 }
 0x644   : > { %4549 = vmatpush1.bf16.msra.mxu1 %v6198_v8 }
 0x645   : > { %4550 = vmatprep.subr.bf16.mxu1 %v6203_v52 }
 0x648   : > { %4551 = vmatpush1.bf16.msra.mxu1 %v6201_v53 }
 0x649   : > { %4552 = vmatprep.subr.bf16.mxu1 %v6206_v54 }
 0x64c   : > { %4553 = vmatpush1.bf16.msra.mxu1 %v6204_v55 }
 0x64d   : > { %4554 = vmatprep.subr.bf16.mxu1 %v6209_v56 }
 0x650   : > { %4555 = vmatpush1.bf16.msra.mxu1 %v6207_v57  ;;  %v3417_v57 = vsub.s32 4, %v7189_v60 }
 0x651   : > { %4556 = vmatprep.subr.bf16.mxu1 %v6212_v58  ;;  %v3421_v58 = vsub.s32 5, %v7189_v60 }
 0x654   : > { %4557 = vmatpush1.bf16.msra.mxu1 %v6210_v59  ;;  %v3418_v59 = vrot.slane %v8076_v2, %v3417_v57 }
 0x655   : > { %4558 = vmatprep.subr.bf16.mxu1 %v6215_v62  ;;  %v3422_v62 = vrot.slane %v8076_v2, %v3421_v58 }
 0x658   : > { %4559 = vmatpush1.bf16.msra.mxu1 %v6213_v1 }
 0x65b   : > { %4575 = vmatmul.mubr.bf16.vlgmr.msra.gmra.mrb[20].mxu1 %v7834_v47 }
 0x6ca   : > { %v4412_v9 = vpop.f32.mrb[16].mxu1  ;;  %v4494_v10 = vpop.f32.mrb[12].mxu0 }
 0x6cb   : > { %v5399_v47 = vadd.f32 %v4412_v9, %v3402_v3  ;;  %v5401_v11 = vadd.f32 %v4494_v10, %v3410_v4  ;;  %v4414_v13 = vpop.f32.mrb[17].mxu1  ;;  %v4496_v14 = vpop.f32.mrb[13].mxu0 }
 0x6cc   : > { %v5400_v12 = vadd.f32 %v4414_v13, %v3406_v6  ;;  %v5402_v16 = vadd.f32 %v4496_v14, %v3414_v7  ;;  %v4416_v17 = vpop.f32.mrb[18].mxu1  ;;  %v4498_v61 = vpop.f32.mrb[14].mxu0 }
 0x6cd   : > { %v4663_v18 = vpack.c.bf16 %v5399_v47, %v5399_v47  ;;  %v4665_v19 = vpack.c.bf16 %v5401_v11, %v5401_v11  ;;  %v4417_v33 = vpop.f32.mrb[19].mxu1  ;;  %v4499_v20 = vpop.f32.mrb[15].mxu0 }
 0x6ce   : > { %v4664_v21 = vpack.c.bf16 %v5400_v12, %v5400_v12  ;;  %v4666_v63 = vpack.c.bf16 %v5402_v16, %v5402_v16 }
 0x6cf   : > { %v4670_v22 = vmul.bf16 1056980736, %v4663_v18  ;;  %v4672_v0 = vmul.bf16 1056980736, %v4665_v19 }
 0x6d0   : > { %v4671_v23 = vmul.bf16 1056980736, %v4664_v21  ;;  %v4673_v24 = vmul.bf16 1056980736, %v4666_v63 }
 0x6d1   : > { %6218 = vtanh.bf16 %v4670_v22 }
 0x6d2   : > { %6220 = vtanh.bf16 %v4672_v0 }
 0x6d3   : > { %6222 = vtanh.bf16 %v4671_v23 }
 0x6d4   : > { %6224 = vtanh.bf16 %v4673_v24 }
 0x6dc   : > { %v6219_v25 = vpop.eup %6218 }
 0x6dd   : > { %v6221_v26 = vpop.eup %6220  ;;  %v4684_v27 = vmul.bf16 1056980736, %v6219_v25 }
 0x6de   : > { %v6223_v28 = vpop.eup %6222  ;;  %v4686_v29 = vmul.bf16 1056980736, %v6221_v26 }
 0x6df   : > { %v6225_v30 = vpop.eup %6224  ;;  %v4691_v31 = vadd.bf16 1056980736, %v4684_v27  ;;  %v4685_v32 = vmul.bf16 1056980736, %v6223_v28 }
 0x6e0   : > { %v4693_v34 = vadd.bf16 1056980736, %v4686_v29  ;;  %v4687_v35 = vmul.bf16 1056980736, %v6225_v30 }
 0x6e1   : > { %v4692_v36 = vadd.bf16 1056980736, %v4685_v32 }
 0x6e2   : > { %v4694_v37 = vadd.bf16 1056980736, %v4687_v35 }
 0x6e3   : > { %v5364_v38 = vcombine.low %v4691_v31, %v4692_v36 }
 0x6e4   : > { %v5365_v39 = vcombine.low %v4693_v34, %v4694_v37 }
 0x6e5   : > { %4720 = vst [vmem:[%s8089_s18] sm:$0xff] %v5364_v38 }
 0x6e6   : > { %4721 = vst [vmem:[%s8089_s18 + $0x8] sm:$0xff] %v5365_v39 }
 0x6eb   : > { %v5387_v40 = vpop.f32.mrb[16].mxu0 }
 0x6ec   : > { %v5388_v41 = vpop.f32.mrb[17].mxu0 }
 0x6ed   : > { %v5389_v42 = vadd.f32 %v5388_v41, %v5387_v40  ;;  %v5390_v43 = vpop.f32.mrb[18].mxu0 }
 0x6ee   : > { %v5391_v44 = vpop.f32.mrb[19].mxu0 }
 0x6ef   : > { %v4618_v48 = vadd.f32 %v5389_v42, %v3426_v46 }
 0x70f   : > { %v4657_v49 = vpop.f32.mrb[20].mxu0 }
 0x710   : > { %v4658_v50 = vadd.f32 %v4657_v49, %v4618_v48  ;;  %v4659_v51 = vpop.f32.mrb[21].mxu0 }
 0x711   : > { %v4660_v15 = vpop.f32.mrb[22].mxu0 }
 0x712   : > { %v4669_v5 = vpack.c.bf16 %v4658_v50, %v4658_v50  ;;  %v4661_v8 = vpop.f32.mrb[23].mxu0 }
 0x714   : > { %v4676_v52 = vmul.bf16 1056980736, %v4669_v5 }
 0x716   : > { %6226 = vtanh.bf16 %v4676_v52 }
 0x721   : > { %v6227_v53 = vpop.eup %6226 }
 0x722   : > { %v4690_v54 = vmul.bf16 1056980736, %v6227_v53 }
 0x724   : > { %v4697_v55 = vadd.bf16 1056980736, %v4690_v54 }
 0x726   : > { %v5367_v56 = vcombine.low %v4697_v55, %v4697_v55 }
 0x728   : > { %4724 = vst.msk [vmem:[%s8089_s18 + $0x18] sm:$0xf] %vm4723_vm4, %v5367_v56 }
 0x72e   : > { %v4576_v1 = vpop.f32.mrb[20].mxu1 }
 0x72f   : > { %v5403_v3 = vadd.f32 %v4576_v1, %v3418_v59  ;;  %v4578_v4 = vpop.f32.mrb[21].mxu1 }
 0x730   : > { %v5404_v6 = vadd.f32 %v4578_v4, %v3422_v62  ;;  %v4580_v7 = vpop.f32.mrb[22].mxu1 }
 0x731   : > { %v4667_v9 = vpack.c.bf16 %v5403_v3, %v5403_v3  ;;  %v4581_v10 = vpop.f32.mrb[23].mxu1 }
 0x732   : > { %v4668_v47 = vpack.c.bf16 %v5404_v6, %v5404_v6 }
 0x733   : > { %v4674_v11 = vmul.bf16 1056980736, %v4667_v9 }
 0x734   : > { %v4675_v13 = vmul.bf16 1056980736, %v4668_v47 }
 0x735   : > { %6228 = vtanh.bf16 %v4674_v11 }
 0x736   : > { %6230 = vtanh.bf16 %v4675_v13 }
 0x740   : > { %v6229_v60 = vpop.eup %6228 }
 0x741   : > { %v6231_v14 = vpop.eup %6230  ;;  %v4688_v2 = vmul.bf16 1056980736, %v6229_v60 }
 0x742   : > { %v4689_v12 = vmul.bf16 1056980736, %v6231_v14 }
 0x743   : > { %v4695_v16 = vadd.bf16 1056980736, %v4688_v2 }
 0x744   : > { %v4696_v17 = vadd.bf16 1056980736, %v4689_v12 }
 0x746   : > { %v5366_v61 = vcombine.low %v4695_v16, %v4696_v17 }
 0x748   : > { %4722 = vst [vmem:[%s8089_s18 + $0x10] sm:$0xff] %v5366_v61 }
 0x749   : > { %6245 = shalt.err (!%p6242_p3)
}
 0x74a   : > { %s6246_s14 = scalar_lea.hbm %s8105_s21, 448  ;;  %s6250_s18 = scalar_lea.hbm %s8184_s0, 896 }
 0x74b   : > { %p6247_p4 = scmp.ne.s32.totalorder %s8105_s21, %s6246_s14  ;;  %p6251_p9 = scmp.lt.u32.totalorder %s8105_s21, %s8184_s0 }
 0x74c   : > { %p6252_p10 = scmp.lt.u32.totalorder %s6250_s18, %s6246_s14  ;;  %p6254_p12 = scmp.lt.u32.totalorder %s6246_s14, %s8105_s21 }
 0x74d   : > { %p6248_p7 = pnand %p6247_p4, %p6417_p5 }
 0x74e   : > { %p6253_p11 = por %p6252_p10, %p6251_p9 }
 0x74f   : > { %p6249_p8 = pneg %p6248_p7 }
 0x750   : > { %p6255_p13 = por %p6254_p12, %p6253_p11 }
 0x752   : > { %p6256_p0 = pnand %p6255_p13, %p6249_p8 }
 0x754   : > { %6259 = shalt.err (!%p6256_p0)
}
 0x755   : > { %5448 = dma.vmem_to_hbm [thread:$0]  (%p6417_p5), %s8107_s23, 448, %s8105_s21, %s4726_s20  }
 0x756 PF: > { %s8185_s26 = sld [smem:[#allocation7_spill]]  ;;  %s8186_s29 = sld [smem:[#allocation5_spill]] }
 0x75c   : > { %p5454_p1 = scmp.ge.s32.totalorder %s8185_s26, 2  ;;  %s4759_s27 = sand.u32 1, %s8186_s29  }
 0x75d   : > { %s4760_s24 = scalar_lea.sflag [#allocation3], %s4759_s27 }
 0x75e   : > { %p5451_p2 = pnand %p5454_p1, %p6421_p6 }
 0x760   : > { %6277 = dma.done.wait (!%p5451_p2), %s4760_s24, 448  }
 0x761   : > { %6279 = vsyncadd (!%p5451_p2), %s4760_s24, 4294966848  ;;  %s8188_s21 = sld [smem:[#allocation8_spill]]  ;;  %s8189_s14 = sld [smem:[#allocation6_spill]] }
 0x762   : > { %s8190_s20 = sld [smem:[#allocation9_spill]]  ;;  %s8191_s18 = smov %s6286_s19 }
 0x767   : > { %p26_p3 = scmp.ge.s32.totalorder %s8188_s21, 4   ;;  %s8192_s19 = smov %s8189_s14 }
 0x769   :  { %28 = sbr.rel (!%p26_p3) target bundleno = 6 (0x6), region = 126 }
 0x770   :  { %4772 = vsyncpa [#allocation3], 1 }
 0x771   :  { %4774 = vsyncpa [#allocation3 + $0x1], 1 }

</bundles_post_ra>
